<compile_context>
chip_gen: v6e
topology: v6e:2x2x1
jax: 0.10.0
libtpu: 0.0.40
codegen_flags: <defaults>
</compile_context>

<pallas_src>
import functools

import jax
import jax.numpy as jnp
from jax.experimental import pallas as pl
from jax.experimental.pallas import tpu as pltpu


def _round_up(x, m):
    return ((x + m - 1) // m) * m


def _log_sigmoid(x):
    # numerically stable logsigmoid(x) = min(x, 0) - log1p(exp(-|x|))
    return jnp.minimum(x, 0.0) - jnp.log1p(jnp.exp(-jnp.abs(x)))


def _w2v_kernel(cxt_ref, lbl_ref, sign_ref, cxt_tab_ref, lbl_tab_ref, out_ref, *,
                num_vocab, inv_ctx):
    """One batch tile of TB combined (left+right) rows.

    cxt_ref      : (TB, C)    int32 context indices
    lbl_ref      : (TB, 1)    int32 raw label indices (kernel applies -num_vocab)
    sign_ref     : (TB, 1)    f32   -1 left rows, +1 right rows, 0 padding rows
    cxt_tab_ref  : (Vcp, Ep)  bf16  padded context embedding table (resident)
    lbl_tab_ref  : (Vlp, Ep)  bf16  padded label embedding table (resident)
    out_ref      : (1, 8, 128) f32  per-tile partial of -(sum logsigmoid), broadcast
    """
    TB, C = cxt_ref.shape
    Vc = cxt_tab_ref.shape[0]
    Vl = lbl_tab_ref.shape[0]

    # ---- context "gather + mean" as a count matrix (no 3-D one-hot) ----
    # int32 accumulation of the C compares, one cast at the end (perf review).
    idx = cxt_ref[...]                                            # (TB, C)
    iota_c = jax.lax.broadcasted_iota(jnp.int32, (TB, Vc), 1)     # (TB, Vc)
    counts_i = jnp.zeros((TB, Vc), jnp.int32)
    for c in range(C):                                            # static unroll
        counts_i = counts_i + (idx[:, c:c + 1] == iota_c).astype(jnp.int32)
    counts = counts_i.astype(jnp.bfloat16)                        # exact: counts <= C

    # ---- label gather as a one-hot (exact in bf16) ----
    lidx = lbl_ref[...] - num_vocab                               # (TB, 1)
    iota_l = jax.lax.broadcasted_iota(jnp.int32, (TB, Vl), 1)     # (TB, Vl)
    lbl_oh = (lidx == iota_l).astype(jnp.bfloat16)                # (TB, Vl)

    # ---- bf16 MXU matmuls, f32 accumulation ----
    cxt_emb = jnp.dot(counts, cxt_tab_ref[...],
                      preferred_element_type=jnp.float32)         # (TB, Ep)
    lbl_emb = jnp.dot(lbl_oh, lbl_tab_ref[...],
                      preferred_element_type=jnp.float32)         # (TB, Ep)

    # ---- one elementwise mul + one lane reduce; 1/C and the +/- sign folded
    # into the (TB, 1) epilogue instead of a full-width VPU pass ----
    dot = jnp.sum(cxt_emb * lbl_emb, axis=1, keepdims=True)       # (TB, 1)
    sm = sign_ref[...]                                            # (TB, 1)
    ls = _log_sigmoid(sm * (dot * inv_ctx))                       # sign & mean folded in
    tile_loss = jnp.sum(ls * jnp.abs(sm))                         # mask out padding rows

    out_ref[...] = jnp.broadcast_to(-tile_loss, out_ref.shape)


def prepare_word2vec_tables(cxt_table, lbl_table, *, lane_multiple=256):
    """Pad the embedding tables to MXU-friendly shapes and cast to bf16.

    Call ONCE when parameters are created/updated (hoisted out of the per-step
    loss per perf review); padded zeros are never selected / contribute 0.
    """
    Vc, E = cxt_table.shape
    Vl, El = lbl_table.shape
    assert El == E
    Ep = _round_up(E, lane_multiple)
    Vcp = _round_up(Vc, lane_multiple)
    Vlp = _round_up(Vl, lane_multiple)
    cxt_p = jnp.zeros((Vcp, Ep), jnp.bfloat16).at[:Vc, :E].set(
        cxt_table.astype(jnp.bfloat16))
    lbl_p = jnp.zeros((Vlp, Ep), jnp.bfloat16).at[:Vl, :E].set(
        lbl_table.astype(jnp.bfloat16))
    return cxt_p, lbl_p


def word2vec_loss(l_cxt, r_cxt, l_lbl, r_lbl, cxt_tab_p, lbl_tab_p, *,
                  num_vocab, tile_rows=512, single_buffer_tables=True):
    """Pallas wrapper. Takes PRE-PADDED bf16 tables; returns the scalar loss."""
    B, C = l_cxt.shape
    Vcp, Ep = cxt_tab_p.shape
    Vlp = lbl_tab_p.shape[0]

    # ---- fuse left/right into one combined row dimension ----
    cxt_all = jnp.concatenate([l_cxt, r_cxt], axis=0).astype(jnp.int32)        # (2B, C)
    lbl_all = jnp.concatenate([l_lbl.reshape(-1, 1), r_lbl.reshape(-1, 1)],
                              axis=0).astype(jnp.int32)                        # (2B, 1)
    sign_all = jnp.concatenate([jnp.full((B, 1), -1.0, jnp.float32),
                                jnp.full((B, 1), 1.0, jnp.float32)], axis=0)   # (2B, 1)

    R = 2 * B
    TB = min(int(tile_rows), _round_up(R, 8))
    TB = max(8, (TB // 8) * 8)                # sublane-aligned tile
    Rp = _round_up(R, TB)
    pad = Rp - R
    if pad:
        cxt_all = jnp.pad(cxt_all, ((0, pad), (0, 0)))
        lbl_all = jnp.pad(lbl_all, ((0, pad), (0, 0)), constant_values=num_vocab)
        sign_all = jnp.pad(sign_all, ((0, pad), (0, 0)))   # padding rows masked (0)
    G = Rp // TB

    kernel = functools.partial(_w2v_kernel, num_vocab=num_vocab, inv_ctx=1.0 / C)

    # Resident tables: constant index_map, so a single buffer is enough.
    table_kwargs = {"pipeline_mode": pl.Buffered(1)} if single_buffer_tables else {}
    n_table_bufs = 1 if single_buffer_tables else 2

    # ---- explicit VMEM budget (perf review): derive from actual buffer sizes ----
    vmem_bytes = (
        n_table_bufs * (Vcp + Vlp) * Ep * 2      # bf16 tables
        + 2 * TB * (C + 2) * 4                   # double-buffered index / sign tiles
        + 2 * 8 * 128 * 4                        # output tiles
        + TB * (Vcp + Vlp) * 4                   # counts / one-hot temporaries
        + 2 * TB * Ep * 4                        # embedding temporaries
        + (4 << 20)                              # headroom
    )
    vmem_limit = int(max(16 << 20, min(vmem_bytes, 64 << 20)))

    partials = pl.pallas_call(
        kernel,
        out_shape=jax.ShapeDtypeStruct((G, 8, 128), jnp.float32),
        grid_spec=pltpu.PrefetchScalarGridSpec(
            num_scalar_prefetch=0,
            grid=(G,),
            in_specs=[
                pl.BlockSpec((TB, C), lambda i: (i, 0)),                # context idx tile
                pl.BlockSpec((TB, 1), lambda i: (i, 0)),                # label idx tile
                pl.BlockSpec((TB, 1), lambda i: (i, 0)),                # sign/mask tile
                pl.BlockSpec((Vcp, Ep), lambda i: (0, 0), **table_kwargs),  # cxt table
                pl.BlockSpec((Vlp, Ep), lambda i: (0, 0), **table_kwargs),  # lbl table
            ],
            out_specs=pl.BlockSpec((1, 8, 128), lambda i: (i, 0, 0)),
        ),
        compiler_params=pltpu.CompilerParams(
            dimension_semantics=("parallel",),        # batch tiles are independent
            vmem_limit_bytes=vmem_limit,
        ),
    )(cxt_all, lbl_all, sign_all, cxt_tab_p, lbl_tab_p)

    # tiny final reduction over the per-tile partial sums
    return jnp.sum(partials[:, 0, 0])


word2vec_loss_jit = jax.jit(
    word2vec_loss,
    static_argnames=("num_vocab", "tile_rows", "single_buffer_tables"))


def word2vec_loss_ref(l_cxt, r_cxt, l_lbl, r_lbl, cxt_table, lbl_table, num_vocab):
    """Pure-JAX reference matching the PyTorch forward."""
    l_cxt_emb = jnp.mean(cxt_table[l_cxt], axis=1)
    r_cxt_emb = jnp.mean(cxt_table[r_cxt], axis=1)
    l_lbl_emb = lbl_table[l_lbl - num_vocab]
    r_lbl_emb = lbl_table[r_lbl - num_vocab]
    l_loss = jax.nn.log_sigmoid(-jnp.sum(l_cxt_emb * l_lbl_emb, axis=1))
    r_loss = jax.nn.log_sigmoid(jnp.sum(r_cxt_emb * r_lbl_emb, axis=1))
    return -(jnp.sum(l_loss) + jnp.sum(r_loss))


if __name__ == "__main__":
    # Small, shape-consistent config:
    #   config_dict['model']['embed_dim'] = 32
    #   config_dict['dataset']['num_vocab'] = 16  -> num_vocab = 17
    embed_dim = 32
    num_vocab = 1 + 16          # cxt_embedding rows
    lbl_vocab = num_vocab - 1   # lbl_embedding rows

    B = 64   # batch of (context window, label) pairs
    C = 4    # context window size

    key = jax.random.PRNGKey(0)
    k_cxt_tab, k_lbl_tab, k_lc, k_rc, k_ll, k_rl = jax.random.split(key, 6)

    # nn.Embedding default init: N(0, 1)
    cxt_table = jax.random.normal(k_cxt_tab, (num_vocab, embed_dim), jnp.float32)
    lbl_table = jax.random.normal(k_lbl_tab, (lbl_vocab, embed_dim), jnp.float32)

    l_cxt = jax.random.randint(k_lc, (B, C), 0, num_vocab, dtype=jnp.int32)
    r_cxt = jax.random.randint(k_rc, (B, C), 0, num_vocab, dtype=jnp.int32)
    # labels arrive offset by num_vocab (forward subtracts it back)
    l_lbl = jax.random.randint(k_ll, (B,), num_vocab, num_vocab + lbl_vocab, dtype=jnp.int32)
    r_lbl = jax.random.randint(k_rl, (B,), num_vocab, num_vocab + lbl_vocab, dtype=jnp.int32)

    # One-time table preparation (hoisted out of the per-step loss).
    cxt_tab_p, lbl_tab_p = prepare_word2vec_tables(cxt_table, lbl_table)

    # tile_rows=64 -> 2 grid steps at this small shape (exercises the batch grid)
    try:
        loss = jax.block_until_ready(
            word2vec_loss_jit(l_cxt, r_cxt, l_lbl, r_lbl, cxt_tab_p, lbl_tab_p,
                              num_vocab=num_vocab, tile_rows=64,
                              single_buffer_tables=True))
    except Exception:
        # Fallback if this jax build rejects pipeline_mode=pl.Buffered(1) for
        # the resident tables: identical kernel, default double-buffered specs.
        loss = jax.block_until_ready(
            word2vec_loss_jit(l_cxt, r_cxt, l_lbl, r_lbl, cxt_tab_p, lbl_tab_p,
                              num_vocab=num_vocab, tile_rows=64,
                              single_buffer_tables=False))

    # Tight check vs. the bf16-rounded tables (kernel math is exact modulo f32 accum)
    ref_bf16 = word2vec_loss_ref(
        l_cxt, r_cxt, l_lbl, r_lbl,
        cxt_table.astype(jnp.bfloat16).astype(jnp.float32),
        lbl_table.astype(jnp.bfloat16).astype(jnp.float32), num_vocab)
    # Loose semantic check vs. the full-f32 reference (bf16 table rounding only)
    ref_f32 = word2vec_loss_ref(l_cxt, r_cxt, l_lbl, r_lbl, cxt_table, lbl_table,
                                num_vocab)

    assert jnp.allclose(loss, ref_bf16, atol=1e-2, rtol=1e-3), (loss, ref_bf16)
    assert jnp.allclose(loss, ref_f32, atol=5e-2, rtol=2e-2), (loss, ref_f32)

    print("KERNEL_OK")
</pallas_src>

<mosaic_0001>
module attributes {stable_mosaic.version = 11 : i64} {
  func.func @_w2v_kernel(%arg0: i32, %arg1: memref<64x4xi32, #tpu.memory_space<vmem>>, %arg2: memref<64x1xi32, #tpu.memory_space<vmem>>, %arg3: memref<64x1xf32, #tpu.memory_space<vmem>>, %arg4: memref<256x256xbf16, #tpu.memory_space<vmem>>, %arg5: memref<256x256xbf16, #tpu.memory_space<vmem>>, %arg6: memref<1x8x128xf32, #tpu.memory_space<vmem>>) attributes {dimension_semantics = [#tpu.dimension_semantics<parallel>], iteration_bounds = array<i64: 2>, scalar_prefetch = 0 : i64, scratch_operands = 0 : i64, tpu.core_type = #tpu.core_type<tc>, window_params = [{transform_indices = @transform_0, window_bounds = array<i64: 64, 4>}, {transform_indices = @transform_1, window_bounds = array<i64: 64, 1>}, {transform_indices = @transform_2, window_bounds = array<i64: 64, 1>}, {pipeline_mode = #tpu.pipeline_mode<synchronous>, transform_indices = @transform_3, window_bounds = array<i64: 256, 256>}, {pipeline_mode = #tpu.pipeline_mode<synchronous>, transform_indices = @transform_4, window_bounds = array<i64: 256, 256>}, {transform_indices = @transform_5, window_bounds = array<i64: 1, 8, 128>}]} {
    %c0 = arith.constant 0 : index
    %c0_0 = arith.constant 0 : index
    %0 = vector.load %arg1[%c0, %c0_0] : memref<64x4xi32, #tpu.memory_space<vmem>>, vector<64x4xi32>
    %1 = tpu.iota {dimensions = array<i32: 1>} : vector<64x256xi32>
    %c0_i32 = arith.constant 0 : i32
    %2 = vector.broadcast %c0_i32 : i32 to vector<64x256xi32>
    %3 = vector.extract_strided_slice %0 {offsets = [0, 0], sizes = [64, 1], strides = [1, 1]} : vector<64x4xi32> to vector<64x1xi32>
    %4 = vector.broadcast %3 : vector<64x1xi32> to vector<64x256xi32>
    %5 = arith.cmpi eq, %4, %1 : vector<64x256xi32>
    %6 = arith.extui %5 : vector<64x256xi1> to vector<64x256xi32>
    %7 = arith.addi %2, %6 : vector<64x256xi32>
    %8 = vector.extract_strided_slice %0 {offsets = [0, 1], sizes = [64, 1], strides = [1, 1]} : vector<64x4xi32> to vector<64x1xi32>
    %9 = vector.broadcast %8 : vector<64x1xi32> to vector<64x256xi32>
    %10 = arith.cmpi eq, %9, %1 : vector<64x256xi32>
    %11 = arith.extui %10 : vector<64x256xi1> to vector<64x256xi32>
    %12 = arith.addi %7, %11 : vector<64x256xi32>
    %13 = vector.extract_strided_slice %0 {offsets = [0, 2], sizes = [64, 1], strides = [1, 1]} : vector<64x4xi32> to vector<64x1xi32>
    %14 = vector.broadcast %13 : vector<64x1xi32> to vector<64x256xi32>
    %15 = arith.cmpi eq, %14, %1 : vector<64x256xi32>
    %16 = arith.extui %15 : vector<64x256xi1> to vector<64x256xi32>
    %17 = arith.addi %12, %16 : vector<64x256xi32>
    %18 = vector.extract_strided_slice %0 {offsets = [0, 3], sizes = [64, 1], strides = [1, 1]} : vector<64x4xi32> to vector<64x1xi32>
    %19 = vector.broadcast %18 : vector<64x1xi32> to vector<64x256xi32>
    %20 = arith.cmpi eq, %19, %1 : vector<64x256xi32>
    %21 = arith.extui %20 : vector<64x256xi1> to vector<64x256xi32>
    %22 = arith.addi %17, %21 : vector<64x256xi32>
    %23 = arith.sitofp %22 : vector<64x256xi32> to vector<64x256xbf16>
    %c0_1 = arith.constant 0 : index
    %c0_2 = arith.constant 0 : index
    %24 = vector.load %arg2[%c0_1, %c0_2] : memref<64x1xi32, #tpu.memory_space<vmem>>, vector<64x1xi32>
    %c17_i32 = arith.constant 17 : i32
    %25 = vector.broadcast %c17_i32 : i32 to vector<64x1xi32>
    %26 = arith.subi %24, %25 : vector<64x1xi32>
    %27 = tpu.iota {dimensions = array<i32: 1>} : vector<64x256xi32>
    %28 = vector.broadcast %26 : vector<64x1xi32> to vector<64x256xi32>
    %29 = arith.cmpi eq, %28, %27 : vector<64x256xi32>
    %30 = arith.extui %29 : vector<64x256xi1> to vector<64x256xi32>
    %31 = arith.sitofp %30 : vector<64x256xi32> to vector<64x256xf32>
    %32 = arith.truncf %31 : vector<64x256xf32> to vector<64x256xbf16>
    %c0_3 = arith.constant 0 : index
    %c0_4 = arith.constant 0 : index
    %33 = vector.load %arg4[%c0_3, %c0_4] : memref<256x256xbf16, #tpu.memory_space<vmem>>, vector<256x256xbf16>
    %cst = arith.constant dense<0.000000e+00> : vector<64x256xf32>
    %34 = tpu.matmul %23, %33, %cst {dimension_numbers = #tpu.dot_dimension_numbers<[1], [0], [0], [1], [0, 0, 1, 1], [], []>} : vector<64x256xbf16>, vector<256x256xbf16>, vector<64x256xf32> -> vector<64x256xf32>
    %c0_5 = arith.constant 0 : index
    %c0_6 = arith.constant 0 : index
    %35 = vector.load %arg5[%c0_5, %c0_6] : memref<256x256xbf16, #tpu.memory_space<vmem>>, vector<256x256xbf16>
    %cst_7 = arith.constant dense<0.000000e+00> : vector<64x256xf32>
    %36 = tpu.matmul %32, %35, %cst_7 {dimension_numbers = #tpu.dot_dimension_numbers<[1], [0], [0], [1], [0, 0, 1, 1], [], []>} : vector<64x256xbf16>, vector<256x256xbf16>, vector<64x256xf32> -> vector<64x256xf32>
    %37 = arith.mulf %34, %36 : vector<64x256xf32>
    %cst_8 = arith.constant dense<0.000000e+00> : vector<64xf32>
    %38 = vector.multi_reduction <add>, %37, %cst_8 [1] : vector<64x256xf32> to vector<64xf32>
    %39 = vector.shape_cast %38 : vector<64xf32> to vector<64x1xf32>
    %c0_9 = arith.constant 0 : index
    %c0_10 = arith.constant 0 : index
    %40 = vector.load %arg3[%c0_9, %c0_10] : memref<64x1xf32, #tpu.memory_space<vmem>>, vector<64x1xf32>
    %cst_11 = arith.constant 2.500000e-01 : f32
    %41 = vector.broadcast %cst_11 : f32 to vector<64x1xf32>
    %42 = arith.mulf %39, %41 : vector<64x1xf32>
    %43 = arith.mulf %40, %42 : vector<64x1xf32>
    %cst_12 = arith.constant 0.000000e+00 : f32
    %44 = vector.broadcast %cst_12 : f32 to vector<64x1xf32>
    %45 = arith.minimumf %43, %44 : vector<64x1xf32>
    %46 = math.absf %43 : vector<64x1xf32>
    %cst_13 = arith.constant 0.000000e+00 : f32
    %47 = vector.broadcast %cst_13 : f32 to vector<64x1xf32>
    %48 = arith.subf %47, %46 : vector<64x1xf32>
    %49 = math.exp %48 : vector<64x1xf32>
    %50 = math.log1p %49 : vector<64x1xf32>
    %51 = arith.subf %45, %50 : vector<64x1xf32>
    %52 = math.absf %40 : vector<64x1xf32>
    %53 = arith.mulf %51, %52 : vector<64x1xf32>
    %54 = vector.shape_cast %53 : vector<64x1xf32> to vector<1x64x1xf32>
    %cst_14 = arith.constant dense<0.000000e+00> : vector<1xf32>
    %55 = vector.multi_reduction <add>, %54, %cst_14 [1, 2] : vector<1x64x1xf32> to vector<1xf32>
    %56 = vector.shape_cast %55 : vector<1xf32> to vector<1x1x1xf32>
    %57 = vector.extract %56[0, 0, 0] : f32 from vector<1x1x1xf32>
    %cst_15 = arith.constant 0.000000e+00 : f32
    %58 = arith.subf %cst_15, %57 : f32
    %59 = vector.broadcast %58 : f32 to vector<1x8x128xf32>
    %c0_16 = arith.constant 0 : index
    %c0_17 = arith.constant 0 : index
    %c0_18 = arith.constant 0 : index
    %60 = vector.load %arg6[%c0_16, %c0_17, %c0_18] : memref<1x8x128xf32, #tpu.memory_space<vmem>>, vector<1x8x128xf32>
    tpu.vector_store %arg6[%c0_16, %c0_17, %c0_18], %59 {strides = array<i32>} : memref<1x8x128xf32, #tpu.memory_space<vmem>>, vector<1x8x128xf32>,
    return
  }
  func.func @transform_0(%arg0: i32) -> (i32, i32) {
    %c0_i32 = arith.constant 0 : i32
    %c0_i32_0 = arith.constant 0 : i32
    return %arg0, %c0_i32 : i32, i32
  }
  func.func @transform_1(%arg0: i32) -> (i32, i32) {
    %c0_i32 = arith.constant 0 : i32
    %c0_i32_0 = arith.constant 0 : i32
    return %arg0, %c0_i32 : i32, i32
  }
  func.func @transform_2(%arg0: i32) -> (i32, i32) {
    %c0_i32 = arith.constant 0 : i32
    %c0_i32_0 = arith.constant 0 : i32
    return %arg0, %c0_i32 : i32, i32
  }
  func.func @transform_3(%arg0: i32) -> (i32, i32) {
    %c0_i32 = arith.constant 0 : i32
    %c0_i32_0 = arith.constant 0 : i32
    %c0_i32_1 = arith.constant 0 : i32
    return %c0_i32, %c0_i32_0 : i32, i32
  }
  func.func @transform_4(%arg0: i32) -> (i32, i32) {
    %c0_i32 = arith.constant 0 : i32
    %c0_i32_0 = arith.constant 0 : i32
    %c0_i32_1 = arith.constant 0 : i32
    return %c0_i32, %c0_i32_0 : i32, i32
  }
  func.func @transform_5(%arg0: i32) -> (i32, i32, i32) {
    %c0_i32 = arith.constant 0 : i32
    %c0_i32_0 = arith.constant 0 : i32
    %c0_i32_1 = arith.constant 0 : i32
    return %arg0, %c0_i32, %c0_i32_0 : i32, i32, i32
  }
}

module attributes {stable_mosaic.version = 11 : i64} {
  func.func @_w2v_kernel(%arg0: i32, %arg1: memref<64x4xi32, #tpu.memory_space<vmem>>, %arg2: memref<64x1xi32, #tpu.memory_space<vmem>>, %arg3: memref<64x1xf32, #tpu.memory_space<vmem>>, %arg4: memref<256x256xbf16, #tpu.memory_space<vmem>>, %arg5: memref<256x256xbf16, #tpu.memory_space<vmem>>, %arg6: memref<1x8x128xf32, #tpu.memory_space<vmem>>) attributes {dimension_semantics = [#tpu.dimension_semantics<parallel>], iteration_bounds = array<i64: 2>, scalar_prefetch = 0 : i64, scratch_operands = 0 : i64, tpu.core_type = #tpu.core_type<tc>, window_params = [{transform_indices = @transform_0, window_bounds = array<i64: 64, 4>}, {transform_indices = @transform_1, window_bounds = array<i64: 64, 1>}, {transform_indices = @transform_2, window_bounds = array<i64: 64, 1>}, {pipeline_mode = #tpu.pipeline_mode<synchronous>, transform_indices = @transform_3, window_bounds = array<i64: 256, 256>}, {pipeline_mode = #tpu.pipeline_mode<synchronous>, transform_indices = @transform_4, window_bounds = array<i64: 256, 256>}, {transform_indices = @transform_5, window_bounds = array<i64: 1, 8, 128>}]} {
    %c0 = arith.constant 0 : index
    %c0_0 = arith.constant 0 : index
    %0 = vector.load %arg1[%c0, %c0_0] : memref<64x4xi32, #tpu.memory_space<vmem>>, vector<64x4xi32>
    %1 = tpu.iota {dimensions = array<i32: 1>} : vector<64x256xi32>
    %c0_i32 = arith.constant 0 : i32
    %2 = vector.broadcast %c0_i32 : i32 to vector<64x256xi32>
    %3 = vector.extract_strided_slice %0 {offsets = [0, 0], sizes = [64, 1], strides = [1, 1]} : vector<64x4xi32> to vector<64x1xi32>
    %4 = vector.broadcast %3 : vector<64x1xi32> to vector<64x256xi32>
    %5 = arith.cmpi eq, %4, %1 : vector<64x256xi32>
    %6 = arith.extui %5 : vector<64x256xi1> to vector<64x256xi32>
    %7 = arith.addi %2, %6 : vector<64x256xi32>
    %8 = vector.extract_strided_slice %0 {offsets = [0, 1], sizes = [64, 1], strides = [1, 1]} : vector<64x4xi32> to vector<64x1xi32>
    %9 = vector.broadcast %8 : vector<64x1xi32> to vector<64x256xi32>
    %10 = arith.cmpi eq, %9, %1 : vector<64x256xi32>
    %11 = arith.extui %10 : vector<64x256xi1> to vector<64x256xi32>
    %12 = arith.addi %7, %11 : vector<64x256xi32>
    %13 = vector.extract_strided_slice %0 {offsets = [0, 2], sizes = [64, 1], strides = [1, 1]} : vector<64x4xi32> to vector<64x1xi32>
    %14 = vector.broadcast %13 : vector<64x1xi32> to vector<64x256xi32>
    %15 = arith.cmpi eq, %14, %1 : vector<64x256xi32>
    %16 = arith.extui %15 : vector<64x256xi1> to vector<64x256xi32>
    %17 = arith.addi %12, %16 : vector<64x256xi32>
    %18 = vector.extract_strided_slice %0 {offsets = [0, 3], sizes = [64, 1], strides = [1, 1]} : vector<64x4xi32> to vector<64x1xi32>
    %19 = vector.broadcast %18 : vector<64x1xi32> to vector<64x256xi32>
    %20 = arith.cmpi eq, %19, %1 : vector<64x256xi32>
    %21 = arith.extui %20 : vector<64x256xi1> to vector<64x256xi32>
    %22 = arith.addi %17, %21 : vector<64x256xi32>
    %23 = arith.sitofp %22 : vector<64x256xi32> to vector<64x256xbf16>
    %c0_1 = arith.constant 0 : index
    %c0_2 = arith.constant 0 : index
    %24 = vector.load %arg2[%c0_1, %c0_2] : memref<64x1xi32, #tpu.memory_space<vmem>>, vector<64x1xi32>
    %c17_i32 = arith.constant 17 : i32
    %25 = vector.broadcast %c17_i32 : i32 to vector<64x1xi32>
    %26 = arith.subi %24, %25 : vector<64x1xi32>
    %27 = tpu.iota {dimensions = array<i32: 1>} : vector<64x256xi32>
    %28 = vector.broadcast %26 : vector<64x1xi32> to vector<64x256xi32>
    %29 = arith.cmpi eq, %28, %27 : vector<64x256xi32>
    %30 = arith.extui %29 : vector<64x256xi1> to vector<64x256xi32>
    %31 = arith.sitofp %30 : vector<64x256xi32> to vector<64x256xf32>
    %32 = arith.truncf %31 : vector<64x256xf32> to vector<64x256xbf16>
    %c0_3 = arith.constant 0 : index
    %c0_4 = arith.constant 0 : index
    %33 = vector.load %arg4[%c0_3, %c0_4] : memref<256x256xbf16, #tpu.memory_space<vmem>>, vector<256x256xbf16>
    %cst = arith.constant dense<0.000000e+00> : vector<64x256xf32>
    %34 = tpu.matmul %23, %33, %cst {dimension_numbers = #tpu.dot_dimension_numbers<[1], [0], [0], [1], [0, 0, 1, 1], [], []>} : vector<64x256xbf16>, vector<256x256xbf16>, vector<64x256xf32> -> vector<64x256xf32>
    %c0_5 = arith.constant 0 : index
    %c0_6 = arith.constant 0 : index
    %35 = vector.load %arg5[%c0_5, %c0_6] : memref<256x256xbf16, #tpu.memory_space<vmem>>, vector<256x256xbf16>
    %cst_7 = arith.constant dense<0.000000e+00> : vector<64x256xf32>
    %36 = tpu.matmul %32, %35, %cst_7 {dimension_numbers = #tpu.dot_dimension_numbers<[1], [0], [0], [1], [0, 0, 1, 1], [], []>} : vector<64x256xbf16>, vector<256x256xbf16>, vector<64x256xf32> -> vector<64x256xf32>
    %37 = arith.mulf %34, %36 : vector<64x256xf32>
    %cst_8 = arith.constant dense<0.000000e+00> : vector<64xf32>
    %38 = vector.multi_reduction <add>, %37, %cst_8 [1] : vector<64x256xf32> to vector<64xf32>
    %39 = vector.shape_cast %38 : vector<64xf32> to vector<64x1xf32>
    %c0_9 = arith.constant 0 : index
    %c0_10 = arith.constant 0 : index
    %40 = vector.load %arg3[%c0_9, %c0_10] : memref<64x1xf32, #tpu.memory_space<vmem>>, vector<64x1xf32>
    %cst_11 = arith.constant 2.500000e-01 : f32
    %41 = vector.broadcast %cst_11 : f32 to vector<64x1xf32>
    %42 = arith.mulf %39, %41 : vector<64x1xf32>
    %43 = arith.mulf %40, %42 : vector<64x1xf32>
    %cst_12 = arith.constant 0.000000e+00 : f32
    %44 = vector.broadcast %cst_12 : f32 to vector<64x1xf32>
    %45 = arith.minimumf %43, %44 : vector<64x1xf32>
    %46 = math.absf %43 : vector<64x1xf32>
    %cst_13 = arith.constant 0.000000e+00 : f32
    %47 = vector.broadcast %cst_13 : f32 to vector<64x1xf32>
    %48 = arith.subf %47, %46 : vector<64x1xf32>
    %49 = math.exp %48 : vector<64x1xf32>
    %50 = math.log1p %49 : vector<64x1xf32>
    %51 = arith.subf %45, %50 : vector<64x1xf32>
    %52 = math.absf %40 : vector<64x1xf32>
    %53 = arith.mulf %51, %52 : vector<64x1xf32>
    %54 = vector.shape_cast %53 : vector<64x1xf32> to vector<1x64x1xf32>
    %cst_14 = arith.constant dense<0.000000e+00> : vector<1xf32>
    %55 = vector.multi_reduction <add>, %54, %cst_14 [1, 2] : vector<1x64x1xf32> to vector<1xf32>
    %56 = vector.shape_cast %55 : vector<1xf32> to vector<1x1x1xf32>
    %57 = vector.extract %56[0, 0, 0] : f32 from vector<1x1x1xf32>
    %cst_15 = arith.constant 0.000000e+00 : f32
    %58 = arith.subf %cst_15, %57 : f32
    %59 = vector.broadcast %58 : f32 to vector<1x8x128xf32>
    %c0_16 = arith.constant 0 : index
    %c0_17 = arith.constant 0 : index
    %c0_18 = arith.constant 0 : index
    %60 = vector.load %arg6[%c0_16, %c0_17, %c0_18] : memref<1x8x128xf32, #tpu.memory_space<vmem>>, vector<1x8x128xf32>
    tpu.vector_store %arg6[%c0_16, %c0_17, %c0_18], %59 {strides = array<i32>} : memref<1x8x128xf32, #tpu.memory_space<vmem>>, vector<1x8x128xf32>,
    return
  }
  func.func @transform_0(%arg0: i32) -> (i32, i32) {
    %c0_i32 = arith.constant 0 : i32
    %c0_i32_0 = arith.constant 0 : i32
    return %arg0, %c0_i32 : i32, i32
  }
  func.func @transform_1(%arg0: i32) -> (i32, i32) {
    %c0_i32 = arith.constant 0 : i32
    %c0_i32_0 = arith.constant 0 : i32
    return %arg0, %c0_i32 : i32, i32
  }
  func.func @transform_2(%arg0: i32) -> (i32, i32) {
    %c0_i32 = arith.constant 0 : i32
    %c0_i32_0 = arith.constant 0 : i32
    return %arg0, %c0_i32 : i32, i32
  }
  func.func @transform_3(%arg0: i32) -> (i32, i32) {
    %c0_i32 = arith.constant 0 : i32
    %c0_i32_0 = arith.constant 0 : i32
    %c0_i32_1 = arith.constant 0 : i32
    return %c0_i32, %c0_i32_0 : i32, i32
  }
  func.func @transform_4(%arg0: i32) -> (i32, i32) {
    %c0_i32 = arith.constant 0 : i32
    %c0_i32_0 = arith.constant 0 : i32
    %c0_i32_1 = arith.constant 0 : i32
    return %c0_i32, %c0_i32_0 : i32, i32
  }
  func.func @transform_5(%arg0: i32) -> (i32, i32, i32) {
    %c0_i32 = arith.constant 0 : i32
    %c0_i32_0 = arith.constant 0 : i32
    %c0_i32_1 = arith.constant 0 : i32
    return %arg0, %c0_i32, %c0_i32_0 : i32, i32, i32
  }
}

</mosaic_0001>

<bundles_post_ra>
// kernel: word2vec_loss.1
= control target key start
LH: loop header
LB: loop body
LE: loop exit
PB: predicated region body
PF: predicated region fallthrough
CT: control target
= control target key end

     0   :  { %10 = vsyncpa [#allocation3], 0  ;;  %s2694_s0 = inlined_call_operand.vmem [shape: s32[128,4], index: 0, kind: input, shape index: {}]   ;;  %s2695_s1 = inlined_call_operand.vmem [shape: s32[128,1], index: 1, kind: input, shape index: {}]   ;;  %s2696_s2 = inlined_call_operand.hbm [shape: f32[128,1], index: 2, kind: input, shape index: {}]   ;;  %s2697_s3 = inlined_call_operand.vmem [shape: bf16[256,256], index: 3, kind: input, shape index: {}]   ;;  %s2698_s4 = inlined_call_operand.hbm [shape: bf16[256,256], index: 4, kind: input, shape index: {}]   ;;  %s2699_s5 = inlined_call_operand.vmem [shape: f32[2,8,128], index: 5, kind: output, shape index: {}]  }
   0x1   :  { %12 = vsyncpa [#allocation3 + $0x1], 0 }
   0x2   :  { %13 = vsyncpa [#allocation5], 0  ;;  %s2031_s18 = smov 0   ;;  %s2033_s19 = smov 0  }
   0x3   :  { %s2035_s20 = smov 0   ;;  %s2037_s21 = smov 0  }
   0x4 LB: > { %s2050_s22 = sadd.s32 4294967295, %s1990_s21   ;;  %p91_p0 = scmp.ne.s32.totalorder %s1982_s19, %s1978_s18  ;;  %s1990_s21 = sphi %s2037_s21, %s2722_s21   ;;  %s1986_s20 = sphi %s2035_s20, %s2721_s20   ;;  %s1982_s19 = sphi %s2033_s19, %s2720_s19   ;;  %s1978_s18 = sphi %s2031_s18, %s2719_s18  }
   0x5   : > { %p2700_p1 = scmp.eq.s32.totalorder %s2050_s22, 0  ;;  %p1564_p2 = scmp.ge.s32.totalorder %s1990_s21, 1 }
   0x6   : > { %p170_p3 = scmp.lt.s32.totalorder %s1990_s21, 3  ;;  %s1992_s25 = smov [#allocation4]  }
   0x7   : > { %p2058_p4 = por %p2700_p1, %p91_p0  ;;  %s185_s26 = sshll.u32 %s1992_s25, 4  ;;  %s186_s26 = int_to_ptr.vmem [resolvable:$true] %s185_s26 }
   0x8   : > { %p2062_p5 = pnand %p1564_p2, %p170_p3  ;;  %s2075_s28 = sadd.s32 1, %s1990_s21  }
   0x9   : > { %s2703_s23 = scalar_select %p2058_p4, 1, 0 }
   0xa   : > { %s2704_s24 = scalar_select %p2062_p5, 1, 0 }
   0xb   : > { %p1693_p6 = pneg %p2062_p5  ;;  %s78_s29 = sadd.s32 1, %s1986_s20 }
   0xc   : > { %s75_s30 = ssub.s32 %s1990_s21, %s2075_s28  ;;  %s1909_s6 = scalar_lea.vmem %s186_s26, 4096 }
   0xd   : > { %p2070_p7 = pnand %p1693_p6, %p2700_p1  ;;  %p1910_p9 = scmp.ne.s32.totalorder %s186_s26, %s1909_s6 }
   0xe   : > { %p1917_p12 = scmp.lt.s32.totalorder %s186_s26, %s186_s26  ;;  %p1918_p13 = scmp.lt.s32.totalorder %s1909_s6, %s1909_s6 }
   0xf   : > { %p1900_p8 = pneg %p2070_p7 }
  0x10   : > { %p1919_p0 = por %p1918_p13, %p1917_p12 }
  0x11   : > { %p1912_p10 = pnand %p1910_p9, %p1900_p8 }
  0x13   : > { %p1913_p11 = pneg %p1912_p10 }
  0x15   : > { %p1920_p2 = pnand %p1919_p0, %p1913_p11 }
  0x17   : > { %1923 = shalt.err (!%p1920_p2)
}
  0x18   : > { %s1993_s7 = smov 128   ;;  %s1994_s8 = smov 8  }
  0x19   : > { %1696 = dma.hbm_to_vmem [thread:$0]  (!%p2070_p7), %s2698_s4, 4096, %s186_s26, [#allocation5], %s1993_s7, %s1993_s7, %s1994_s8  }
  0x1a   : > { %p76_p3 = scmp.eq.s32.totalorder %s75_s30, 0  ;;  %p85_p6 = scmp.ne.s32.totalorder %s1986_s20, %s1982_s19 }
  0x1b   : > { %p86_p8 = scmp.eq.s32.totalorder %s1990_s21, 0  ;;  %p1702_p9 = scmp.lt.s32.totalorder %s1990_s21, 2 }
  0x1c   : > { %s2095_s11 = scalar_select %p76_p3, %s1986_s20, %s78_s29  }
  0x1d   : > { %p87_p10 = por %p86_p8, %p85_p6  ;;  %s217_s12 = sand.u32 1, %s1986_s20  }
  0x1e   : > { %s1567_s13 = sshll.u32 %s217_s12, 6  ;;  %s1684_s14 = sshll.u32 %s1990_s21, 10 }
  0x1f   : > { %s2102_s17 = scalar_lea.hbm %s2696_s2, %s1684_s14  ;;  %s221_s18 = scalar_lea.vmem [#allocation2], %s1567_s13 }
  0x20   : > { %s228_s25 = sshll.u32 %s221_s18, 4  ;;  %p2106_p7 = pnand %p1702_p9, %p87_p10  ;;  %s2104_s25 = int_to_ptr.vmem [resolvable:$true] %s228_s25 }
  0x21   : > { %s2110_s27 = scalar_lea.sflag [#allocation3], %s217_s12  ;;  %s1924_s21 = scalar_lea.hbm %s2102_s17, 1024 }
  0x22   : > { %p1925_p11 = scmp.ne.s32.totalorder %s2102_s17, %s1924_s21  ;;  %p1926_p12 = pneg %p2106_p7 }
  0x23   : > { %s1929_s6 = scalar_lea.hbm %s2696_s2, 2048  ;;  %p1930_p2 = scmp.lt.s32.totalorder %s2102_s17, %s2696_s2 }
  0x24   : > { %p1927_p13 = pnand %p1926_p12, %p1925_p11  ;;  %p1931_p3 = scmp.lt.s32.totalorder %s1929_s6, %s1924_s21 }
  0x26   : > { %p1928_p0 = pneg %p1927_p13  ;;  %p1932_p6 = por %p1931_p3, %p1930_p2 }
  0x28   : > { %p1933_p8 = pnand %p1932_p6, %p1928_p0 }
  0x2a   : > { %1936 = shalt.err (!%p1933_p8)
}
  0x2b   : > { %s1937_s12 = scalar_lea.vmem %s2104_s25, 1024  ;;  %s1995_s13 = smov [#allocation2]  }
  0x2c   : > { %p1938_p9 = scmp.ne.s32.totalorder %s2104_s25, %s1937_s12  ;;  %s1942_s14 = sshll.u32 %s1995_s13, 4  ;;  %s1943_s14 = int_to_ptr.vmem [resolvable:$false] %s1942_s14 }
  0x2d   : > { %s1944_s15 = scalar_lea.vmem %s1943_s14, 2048  ;;  %p1945_p13 = scmp.lt.s32.totalorder %s2104_s25, %s1943_s14 }
  0x2e   : > { %p1940_p10 = pnand %p1938_p9, %p1926_p12  ;;  %p1946_p1 = scmp.lt.s32.totalorder %s1944_s15, %s1937_s12 }
  0x30   : > { %p1941_p11 = pneg %p1940_p10  ;;  %p1947_p4 = por %p1946_p1, %p1945_p13 }
  0x32   : > { %p1948_p5 = pnand %p1947_p4, %p1941_p11 }
  0x34   : > { %1951 = shalt.err (!%p1948_p5)
}
  0x35   : > { %1700 = dma.hbm_to_vmem [thread:$0]  (!%p2106_p7), %s2102_s17, 1024, %s2104_s25, %s2110_s27, %s1993_s7, %s1993_s7, %s1994_s8  }
  0x36   : > { %p2707_p12 = scmp.ne.s32.totalorder %s2704_s24, 0 }
  0x37   : > { %s242_s16 = sand.u32 (!%p2707_p12), 1, %s1982_s19   ;;  %p2708_p1 = scmp.ne.s32.totalorder (!%p2707_p12), %s2703_s23, 0 }
  0x38   : > { %240 = sbr.rel (%p2707_p12) target bundleno = 911 (0x38f), region = 40  ;;  %s1571_s18 = sshll.u32 (!%p2707_p12), %s242_s16, 6 }
  0x39   : > { %s243_s21 = scalar_lea.sflag (!%p2707_p12), [#allocation3], %s242_s16  ;;  %s2137_s29 = scalar_lea.vmem (!%p2707_p12), [#allocation2], %s1571_s18 }
  0x3d   : > { %1969 = dma.done.wait (%p2708_p1), %s243_s21, 1024  }
  0x3e   : > { %1971 = vsyncadd (%p2708_p1), %s243_s21, 4294966272  ;;  %p2709_p4 = scmp.eq.s32.totalorder %s2050_s22, 0 }
  0x40   : > { %1973 = dma.done.wait (%p2709_p4), [#allocation5], 4096   ;;  %p2710_p5 = pmov %p2709_p4 }
  0x41   : > { %s1573_s24 = sshll.u32 %s2050_s22, 3  ;;  %v1996_v0 = vmov 2   ;;  %v1997_v1 = vmov 1   ;;  %v1770_v4 = vld [vmem:[%s2697_s3 + $0x74] ss:$8 sps:$4 sm:$0xff]   ;;  %v1998_v5 = vmov 3  }
  0x42   : > { %1975 = vsyncadd (%p2710_p5), [#allocation5], 4294963200  ;;  %1745 = vset.pattern.permute.xlu0 %v1996_v0  ;;  %1744 = vset.pattern.permute.xlu1 %v1997_v1  ;;  %p287_p7 = scmp.lt.s32.totalorder %s1573_s24, 15  ;;  %v1772_v6 = vld [vmem:[%s2697_s3 + $0x70] ss:$8 sps:$4 sm:$0xff]   ;;  %v1999_v17 = vmov 0  }
  0x43   : > { %898 = vmatprep.subr.bf16.mxu0 %v1770_v4  ;;  %v1773_v7 = vld [vmem:[%s2697_s3 + $0x64] ss:$8 sps:$4 sm:$0xff]   ;;  %v1775_v9 = vld [vmem:[%s2697_s3 + $0x60] ss:$8 sps:$4 sm:$0xff]   ;;  %v1776_v10 = vld [vmem:[%s2697_s3 + $0x54] ss:$8 sps:$4 sm:$0xff]  }
  0x44   : > { %s2724_s24 = smov (!%p287_p7, %s1573_s24), 15  ;;  %899 = vmatpush1.bf16.msra.mxu0 %v1772_v6  ;;  %v1782_v11 = vld [vmem:[#allocation4 + $0x74] ss:$8 sps:$4 sm:$0xff]   ;;  %v1784_v12 = vld [vmem:[#allocation4 + $0x70] ss:$8 sps:$4 sm:$0xff]   ;;  %p299_p0 = scmp.lt.s32.totalorder %s2050_s22, 1 }
  0x45   : > { %s1574_s23 = sshll.u32 %s2724_s24, 3  ;;  %900 = vmatprep.subr.bf16.mxu0 %v1773_v7  ;;  %v1778_v13 = vld [vmem:[%s2697_s3 + $0x50] ss:$8 sps:$4 sm:$0xff]   ;;  %v1779_v14 = vld [vmem:[%s2697_s3 + $0x44] ss:$8 sps:$4 sm:$0xff]   ;;  %1163 = vmatprep.subr.bf16.mxu1 %v1782_v11 }
  0x46   : > { %s2158_s17 = scalar_lea.vmem %s2694_s0, %s1574_s23  ;;  %1164 = vmatpush1.bf16.msra.mxu1 %v1784_v12  ;;  %v1788_v15 = vld [vmem:[#allocation4 + $0x64] ss:$8 sps:$4 sm:$0xff]   ;;  %v1790_v16 = vld [vmem:[#allocation4 + $0x60] ss:$8 sps:$4 sm:$0xff]   ;;  %s2196_s25 = scalar_lea.vmem %s2695_s1, %s1574_s23  ;;  %v1785_v19 = vld [vmem:[%s2697_s3 + $0x34] ss:$8 sps:$4 sm:$0xff]  }
  0x47   : > { %v303_v2 = vld [vmem:[%s2158_s17] sm:$0xff]  ;;  %v304_v3 = vld [vmem:[%s2158_s17 + $0x8] sm:$0xff]  ;;  %v2173_v8 = vld [vmem:[%s2158_s17 + $0x10] sm:$0xff]  ;;  %1165 = vmatprep.subr.bf16.mxu1 %v1788_v15  ;;  %s2726_s22 = smov (!%p299_p0, %s2050_s22), 1 }
  0x48   : > { %443 = vperm.xlu0 %1745, %v303_v2   ;;  %371 = vperm.xlu1 %1744, %v303_v2   ;;  %v1781_v18 = vld [vmem:[%s2697_s3 + $0x40] ss:$8 sps:$4 sm:$0xff]   ;;  %v1794_v20 = vld [vmem:[#allocation4 + $0x54] ss:$8 sps:$4 sm:$0xff]   ;;  %v1796_v21 = vld [vmem:[#allocation4 + $0x50] ss:$8 sps:$4 sm:$0xff]  }
  0x49   : > { %901 = vmatpush1.bf16.msra.mxu0 %v1775_v9  ;;  %v2205_v22 = vld [vmem:[%s2158_s17 + $0x28] sm:$0xff]  ;;  %v613_v23 = vld [vmem:[%s2196_s25 + $0x18] sm:$0xff]  ;;  %v2228_v34 = vld [vmem:[%s2158_s17 + $0x30] sm:$0xff] }
  0x4a   : > { %902 = vmatprep.subr.bf16.mxu0 %v1776_v10  ;;  %1166 = vmatpush1.bf16.msra.mxu1 %v1790_v16  ;;  %v2210_v24 = vld [vmem:[%s2158_s17 + $0x18] sm:$0xff]  ;;  %v1800_v26 = vld [vmem:[#allocation4 + $0x44] ss:$8 sps:$4 sm:$0xff]   ;;  %v1802_v28 = vld [vmem:[#allocation4 + $0x40] ss:$8 sps:$4 sm:$0xff]   ;;  %v1581_v30 = vadd.s32 4294967279, %v613_v23 }
  0x4b   : > { %1167 = vmatprep.subr.bf16.mxu1 %v1794_v20  ;;  %v1787_v25 = vld [vmem:[%s2697_s3 + $0x30] ss:$8 sps:$4 sm:$0xff]   ;;  %v1791_v27 = vld [vmem:[%s2697_s3 + $0x24] ss:$8 sps:$4 sm:$0xff]   ;;  %v1806_v29 = vld [vmem:[#allocation4 + $0x34] ss:$8 sps:$4 sm:$0xff]  }
  0x4c   : > { %1748 = vset.pattern.permute.xlu0 %v1998_v5  ;;  %374 = vperm.xlu1 %1744, %v304_v3   ;;  %v1793_v31 = vld [vmem:[%s2697_s3 + $0x20] ss:$8 sps:$4 sm:$0xff]   ;;  %v1797_v32 = vld [vmem:[%s2697_s3 + $0x14] ss:$8 sps:$4 sm:$0xff]   ;;  %v1808_v33 = vld [vmem:[#allocation4 + $0x30] ss:$8 sps:$4 sm:$0xff]  }
  0x4d   : > { %518 = vperm.xlu0 %1748, %v304_v3   ;;  %903 = vmatpush1.bf16.msra.mxu0 %v1778_v13  ;;  %v1812_v35 = vld [vmem:[#allocation4 + $0x24] ss:$8 sps:$4 sm:$0xff]   ;;  %v1799_v36 = vld [vmem:[%s2697_s3 + $0x10] ss:$8 sps:$4 sm:$0xff]   ;;  %v1814_v38 = vld [vmem:[#allocation4 + $0x20] ss:$8 sps:$4 sm:$0xff]  }
  0x4e   : > { %904 = vmatprep.subr.bf16.mxu0 %v1779_v14  ;;  %1168 = vmatpush1.bf16.msra.mxu1 %v1796_v21  ;;  %v1803_v37 = vld [vmem:[%s2697_s3 + $0x4] ss:$8 sps:$4 sm:$0xff]   ;;  %v1818_v40 = vld [vmem:[#allocation4 + $0x14] ss:$8 sps:$4 sm:$0xff]   ;;  %v1805_v41 = vld [vmem:[%s2697_s3] ss:$8 sps:$4 sm:$0xff]  }
  0x4f   : > { %1169 = vmatprep.subr.bf16.mxu1 %v1800_v26  ;;  %v610_v39 = vld [vmem:[%s2196_s25] sm:$0xff]  ;;  %v1809_v42 = vld [vmem:[%s2697_s3 + $0xf4] ss:$8 sps:$4 sm:$0xff]   ;;  %v1820_v43 = vld [vmem:[#allocation4 + $0x10] ss:$8 sps:$4 sm:$0xff]  }
  0x50   : > { %1746 = vset.pattern.permute.xlu1 %v1996_v0  ;;  %v1578_v44 = vadd.s32 4294967279, %v610_v39  ;;  %v611_v45 = vld [vmem:[%s2196_s25 + $0x8] sm:$0xff]  ;;  %v1811_v47 = vld [vmem:[%s2697_s3 + $0xf0] ss:$8 sps:$4 sm:$0xff]   ;;  %v1830_v51 = vld [vmem:[#allocation4 + $0xf4] ss:$8 sps:$4 sm:$0xff]  }
  0x51   : > { %521 = vperm.xlu0 %1748, %v2173_v8   ;;  %446 = vperm.xlu1 %1746, %v304_v3   ;;  %v1824_v46 = vld [vmem:[#allocation4 + $0x4] ss:$8 sps:$4 sm:$0xff]   ;;  %v1826_v49 = vld [vmem:[#allocation4] ss:$8 sps:$4 sm:$0xff]   ;;  %v1579_v50 = vadd.s32 4294967279, %v611_v45  ;;  %v612_v21 = vld [vmem:[%s2196_s25 + $0x10] sm:$0xff] }
  0x52   : > { %905 = vmatpush1.bf16.msra.mxu0 %v1781_v18  ;;  %1170 = vmatpush1.bf16.msra.mxu1 %v1802_v28  ;;  %v1815_v48 = vld [vmem:[%s2697_s3 + $0xe4] ss:$8 sps:$4 sm:$0xff]   ;;  %v1817_v52 = vld [vmem:[%s2697_s3 + $0xe0] ss:$8 sps:$4 sm:$0xff]   ;;  %v1821_v53 = vld [vmem:[%s2697_s3 + $0xd4] ss:$8 sps:$4 sm:$0xff]  }
  0x53   : > { %906 = vmatprep.subr.bf16.mxu0 %v1785_v19  ;;  %1171 = vmatprep.subr.bf16.mxu1 %v1806_v29  ;;  %v1832_v54 = vld [vmem:[#allocation4 + $0xf0] ss:$8 sps:$4 sm:$0xff]   ;;  %v1836_v55 = vld [vmem:[#allocation4 + $0xe4] ss:$8 sps:$4 sm:$0xff]   ;;  %v1838_v58 = vld [vmem:[#allocation4 + $0xe0] ss:$8 sps:$4 sm:$0xff]  }
  0x54   : > { %v1823_v56 = vld [vmem:[%s2697_s3 + $0xd0] ss:$8 sps:$4 sm:$0xff]   ;;  %v1827_v57 = vld [vmem:[%s2697_s3 + $0xc4] ss:$8 sps:$4 sm:$0xff]   ;;  %v1842_v59 = vld [vmem:[#allocation4 + $0xd4] ss:$8 sps:$4 sm:$0xff]  }
  0x55   : > { %1753 = vset.pattern.permute.xlu0 %v1999_v17  ;;  %1747 = vset.pattern.permute.xlu1 %v1998_v5  ;;  %v2276_v60 = vld [vmem:[%s2158_s17 + $0x20] sm:$0xff]  ;;  %v1833_v62 = vld [vmem:[%s2697_s3 + $0xb4] ss:$8 sps:$4 sm:$0xff]   ;;  %v1844_v63 = vld [vmem:[#allocation4 + $0xd0] ss:$8 sps:$4 sm:$0xff]  }
  0x56   : > { %315 = vperm.xlu0 %1753, %v303_v2   ;;  %515 = vperm.xlu1 %1747, %v303_v2   ;;  %v1829_v61 = vld [vmem:[%s2697_s3 + $0xc0] ss:$8 sps:$4 sm:$0xff]   ;;  %v1848_v2 = vld [vmem:[#allocation4 + $0xc4] ss:$8 sps:$4 sm:$0xff]   ;;  %v1835_v4 = vld [vmem:[%s2697_s3 + $0xb0] ss:$8 sps:$4 sm:$0xff]  }
  0x57   : > { %907 = vmatpush1.bf16.msra.mxu0 %v1787_v25  ;;  %1172 = vmatpush1.bf16.msra.mxu1 %v1808_v33  ;;  %v1839_v6 = vld [vmem:[%s2697_s3 + $0xa4] ss:$8 sps:$4 sm:$0xff]   ;;  %v1850_v7 = vld [vmem:[#allocation4 + $0xc0] ss:$8 sps:$4 sm:$0xff]   ;;  %v1854_v10 = vld [vmem:[#allocation4 + $0xb4] ss:$8 sps:$4 sm:$0xff]  }
  0x58   : > { %908 = vmatprep.subr.bf16.mxu0 %v1791_v27  ;;  %1173 = vmatprep.subr.bf16.mxu1 %v1812_v35  ;;  %v1841_v9 = vld [vmem:[%s2697_s3 + $0xa0] ss:$8 sps:$4 sm:$0xff]   ;;  %v1845_v11 = vld [vmem:[%s2697_s3 + $0x94] ss:$8 sps:$4 sm:$0xff]   ;;  %v1856_v13 = vld [vmem:[#allocation4 + $0xb0] ss:$8 sps:$4 sm:$0xff]  }
  0x59   : > { %v1847_v14 = vld [vmem:[%s2697_s3 + $0x90] ss:$8 sps:$4 sm:$0xff]   ;;  %v1857_v15 = vld [vmem:[#allocation4 + $0xa4] ss:$8 sps:$4 sm:$0xff]   ;;  %v1859_v18 = vld [vmem:[#allocation4 + $0xa0] ss:$8 sps:$4 sm:$0xff]  }
  0x5a   : > { %318 = vperm.xlu0 %1753, %v304_v3   ;;  %1749 = vset.pattern.permute.xlu1 %v1999_v17  ;;  %v2287_v3 = vld [vmem:[%s2158_s17 + $0x38] sm:$0xff]  ;;  %v1851_v16 = vld [vmem:[%s2697_s3 + $0x84] ss:$8 sps:$4 sm:$0xff]   ;;  %v1853_v19 = vld [vmem:[%s2697_s3 + $0x80] ss:$8 sps:$4 sm:$0xff]  }
  0x5b   : > { %321 = vperm.xlu1 %1749, %v2173_v8   ;;  %909 = vmatpush1.bf16.msra.mxu0 %v1793_v31  ;;  %v1860_v20 = vld [vmem:[#allocation4 + $0x94] ss:$8 sps:$4 sm:$0xff]   ;;  %v1862_v23 = vld [vmem:[#allocation4 + $0x90] ss:$8 sps:$4 sm:$0xff]   ;;  %v1863_v25 = vld [vmem:[#allocation4 + $0x84] ss:$8 sps:$4 sm:$0xff]  }
  0x5c   : > { %910 = vmatprep.subr.bf16.mxu0 %v1797_v32  ;;  %1174 = vmatpush1.bf16.msra.mxu1 %v1814_v38  ;;  %v1865_v26 = vld [vmem:[#allocation4 + $0x80] ss:$8 sps:$4 sm:$0xff]   ;;  %v311_v32 = vlaneseq }
  0x5d   : > { %1175 = vmatprep.subr.bf16.mxu1 %v1818_v40  ;;  %v614_v27 = vld [vmem:[%s2196_s25 + $0x20] sm:$0xff]  ;;  %v615_v29 = vld [vmem:[%s2196_s25 + $0x28] sm:$0xff] }
  0x5e   : > { %330 = vperm.xlu0 %1753, %v2205_v22   ;;  %v1582_v28 = vadd.s32 4294967279, %v614_v27  ;;  %v2339_v35 = vand.u32 127, %v311_v32 }
  0x5f   : > { %324 = vperm.xlu1 %1749, %v2210_v24   ;;  %911 = vmatpush1.bf16.msra.mxu0 %v1799_v36 }
  0x60   : > { %912 = vmatprep.subr.bf16.mxu0 %v1803_v37  ;;  %1176 = vmatpush1.bf16.msra.mxu1 %v1820_v43  ;;  %v2344_v38 = vadd.s32 128, %v2339_v35 }
  0x61   : > { %1177 = vmatprep.subr.bf16.mxu1 %v1824_v46 }
  0x62   : > { %636 = vperm.xlu0 %1753, %v1581_v30   ;;  %v1583_v30 = vadd.s32 4294967279, %v615_v29 }
  0x63   : > { %1750 = vset.pattern.permute.xlu1 %v1997_v1  ;;  %913 = vmatpush1.bf16.msra.mxu0 %v1805_v41 }
  0x64   : > { %380 = vperm.xlu1 %1750, %v2210_v24   ;;  %914 = vmatprep.subr.bf16.mxu0 %v1809_v42 }
  0x65   : > { %1178 = vmatpush1.bf16.msra.mxu1 %v1826_v49 }
  0x66   : > { %333 = vperm.xlu0 %1753, %v2228_v34   ;;  %1179 = vmatprep.subr.bf16.mxu1 %v1830_v51 }
  0x67   : > { %915 = vmatpush2.bf16.msra.mxu0 %v1811_v47 }
  0x68   : > { %1751 = vset.pattern.permute.xlu1 %v1996_v0  ;;  %916 = vmatprep.subr.bf16.mxu0 %v1815_v48 }
  0x69   : > { %449 = vperm.xlu1 %1751, %v2173_v8   ;;  %1180 = vmatpush2.bf16.msra.mxu1 %v1832_v54 }
  0x6a   : > { %1760 = vset.pattern.permute.xlu0 %v1997_v1  ;;  %1181 = vmatprep.subr.bf16.mxu1 %v1836_v55 }
  0x6b   : > { %377 = vperm.xlu0 %1760, %v2173_v8   ;;  %917 = vmatpush2.bf16.msra.mxu0 %v1817_v52  ;;  %v617_v8 = vld [vmem:[%s2196_s25 + $0x38] sm:$0xff] }
  0x6c   : > { %918 = vmatprep.subr.bf16.mxu0 %v1821_v53  ;;  %v1585_v12 = vadd.s32 4294967279, %v617_v8 }
  0x6d   : > { %1752 = vset.pattern.permute.xlu1 %v1999_v17  ;;  %1182 = vmatpush2.bf16.msra.mxu1 %v1838_v58 }
  0x6e   : > { %627 = vperm.xlu1 %1752, %v1578_v44   ;;  %1183 = vmatprep.subr.bf16.mxu1 %v1842_v59 }
  0x6f   : > { %389 = vperm.xlu0 %1760, %v2228_v34   ;;  %919 = vmatpush2.bf16.msra.mxu0 %v1823_v56 }
  0x70   : > { %920 = vmatprep.subr.bf16.mxu0 %v1827_v57 }
  0x71   : > { %1184 = vmatpush2.bf16.msra.mxu1 %v1844_v63 }
  0x72   : > { %630 = vperm.xlu1 %1752, %v1579_v50   ;;  %1185 = vmatprep.subr.bf16.mxu1 %v1848_v2 }
  0x73   : > { %1762 = vset.pattern.permute.xlu0 %v1996_v0  ;;  %921 = vmatpush2.bf16.msra.mxu0 %v1829_v61 }
  0x74   : > { %452 = vperm.xlu0 %1762, %v2210_v24   ;;  %922 = vmatprep.subr.bf16.mxu0 %v1833_v62 }
  0x75   : > { %1186 = vmatpush2.bf16.msra.mxu1 %v1850_v7 }
  0x76   : > { %1754 = vset.pattern.permute.xlu1 %v1998_v5  ;;  %1187 = vmatprep.subr.bf16.mxu1 %v1854_v10 }
  0x77   : > { %524 = vperm.xlu1 %1754, %v2210_v24   ;;  %923 = vmatpush2.bf16.msra.mxu0 %v1835_v4  ;;  %v1580_v24 = vadd.s32 4294967279, %v612_v21 }
  0x78   : > { %455 = vperm.xlu0 %1762, %v2276_v60   ;;  %924 = vmatprep.subr.bf16.mxu0 %v1839_v6 }
  0x79   : > { %1188 = vmatpush2.bf16.msra.mxu1 %v1856_v13 }
  0x7a   : > { %1189 = vmatprep.subr.bf16.mxu1 %v1857_v15 }
  0x7b   : > { %1755 = vset.pattern.permute.xlu1 %v1999_v17  ;;  %925 = vmatpush2.bf16.msra.mxu0 %v1841_v9 }
  0x7c   : > { %327 = vperm.xlu1 %1755, %v2276_v60   ;;  %464 = vperm.xlu0 %1762, %v2287_v3  }
  0x7d   : > { %926 = vmatprep.subr.bf16.mxu0 %v1845_v11  ;;  %1190 = vmatpush2.bf16.msra.mxu1 %v1859_v18 }
  0x7e   : > { %1191 = vmatprep.subr.bf16.mxu1 %v1860_v20 }
  0x7f   : > { %927 = vmatpush2.bf16.msra.mxu0 %v1847_v14 }
  0x80   : > { %1756 = vset.pattern.permute.xlu1 %v1997_v1  ;;  %1766 = vset.pattern.permute.xlu0 %v1998_v5 }
  0x81   : > { %383 = vperm.xlu1 %1756, %v2276_v60   ;;  %533 = vperm.xlu0 %1766, %v2228_v34  }
  0x82   : > { %928 = vmatprep.subr.bf16.mxu0 %v1851_v16  ;;  %1192 = vmatpush2.bf16.msra.mxu1 %v1862_v23 }
  0x83   : > { %929 = vmatpush2.bf16.msra.mxu0 %v1853_v19  ;;  %1193 = vmatprep.subr.bf16.mxu1 %v1863_v25 }
  0x85   : > { %386 = vperm.xlu1 %1756, %v2205_v22   ;;  %1769 = vset.pattern.permute.xlu0 %v1999_v17 }
  0x86   : > { %648 = vperm.xlu0 %1769, %v1585_v12   ;;  %1194 = vmatpush2.bf16.msra.mxu1 %v1865_v26 }
  0x89   : > { %1757 = vset.pattern.permute.xlu1 %v1996_v0 }
  0x8a   : > { %458 = vperm.xlu1 %1757, %v2205_v22  }
  0x8e   : > { %1758 = vset.pattern.permute.xlu1 %v1999_v17 }
  0x8f   : > { %633 = vperm.xlu1 %1758, %v1580_v24  }
  0x93   : > { %1759 = vset.pattern.permute.xlu1 %v1998_v5 }
  0x94   : > { %527 = vperm.xlu1 %1759, %v2276_v60  }
  0x98   : > { %530 = vperm.xlu1 %1759, %v2205_v22   ;;  %v616_v22 = vld [vmem:[%s2196_s25 + $0x30] sm:$0xff] }
  0x9c   : > { %1761 = vset.pattern.permute.xlu1 %v1999_v17 }
  0x9d   : > { %336 = vperm.xlu1 %1761, %v2287_v3  }
  0xa1   : > { %1763 = vset.pattern.permute.xlu1 %v1997_v1  ;;  %v1584_v1 = vadd.s32 4294967279, %v616_v22 }
  0xa2   : > { %392 = vperm.xlu1 %1763, %v2287_v3  }
  0xa6   : > { %1764 = vset.pattern.permute.xlu1 %v1996_v0 }
  0xa7   : > { %461 = vperm.xlu1 %1764, %v2228_v34  }
  0xab   : > { %1765 = vset.pattern.permute.xlu1 %v1999_v17 }
  0xac   : > { %639 = vperm.xlu1 %1765, %v1582_v28  }
  0xb0   : > { %642 = vperm.xlu1 %1765, %v1583_v30  }
  0xb4   : > { %1767 = vset.pattern.permute.xlu1 %v1998_v5 }
  0xb5   : > { %536 = vperm.xlu1 %1767, %v2287_v3  }
  0xb9   : > { %1768 = vset.pattern.permute.xlu1 %v1999_v17 }
  0xba   : > { %645 = vperm.xlu1 %1768, %v1584_v1  }
  0xc3   : > { %v372_v31 = vpop.permute.xlu1 %371  ;;  %v444_v0 = vpop.permute.xlu0 %443 }
  0xc4   : > { %vm394_vm0 = vcmp.eq.s32.totalorder %v372_v31, %v2339_v35  ;;  %vm395_vm1 = vcmp.eq.s32.totalorder %v372_v31, %v2344_v38  ;;  %vm466_vm2 = vcmp.eq.s32.totalorder %v444_v0, %v2339_v35  ;;  %vm467_vm3 = vcmp.eq.s32.totalorder %v444_v0, %v2344_v38 }
  0xc5   : > { %v410_v40 = vsel %vm394_vm0, 1, %v1999_v17  ;;  %v411_v43 = vsel %vm395_vm1, 1, %v1999_v17  ;;  %v482_v44 = vsel %vm466_vm2, 1, %v1999_v17  ;;  %v483_v46 = vsel %vm467_vm3, 1, %v1999_v17 }
  0xc7   : > { %v375_v33 = vpop.permute.xlu1 %374 }
  0xc8   : > { %v519_v34 = vpop.permute.xlu0 %518  ;;  %vm396_vm4 = vcmp.eq.s32.totalorder %v375_v33, %v2339_v35  ;;  %vm397_vm5 = vcmp.eq.s32.totalorder %v375_v33, %v2344_v38 }
  0xc9   : > { %v412_v47 = vsel %vm396_vm4, 1, %v1999_v17  ;;  %v413_v48 = vsel %vm397_vm5, 1, %v1999_v17  ;;  %vm540_vm8 = vcmp.eq.s32.totalorder %v519_v34, %v2339_v35  ;;  %vm541_vm12 = vcmp.eq.s32.totalorder %v519_v34, %v2344_v38 }
  0xca   : > { %v556_v60 = vsel %vm540_vm8, 1, %v1999_v17  ;;  %v557_v63 = vsel %vm541_vm12, 1, %v1999_v17 }
  0xcc   : > { %v447_v36 = vpop.permute.xlu1 %446  ;;  %v2341_v37 = vpop.permute.xlu0 %521 }
  0xcd   : > { %vm468_vm9 = vcmp.eq.s32.totalorder %v447_v36, %v2339_v35  ;;  %vm469_vm13 = vcmp.eq.s32.totalorder %v447_v36, %v2344_v38  ;;  %vm542_vm0 = vcmp.eq.s32.totalorder %v2341_v37, %v2339_v35  ;;  %vm543_vm1 = vcmp.eq.s32.totalorder %v2341_v37, %v2344_v38 }
  0xce   : > { %v484_v57 = vsel %vm468_vm9, 1, %v1999_v17  ;;  %v485_v2 = vsel %vm469_vm13, 1, %v1999_v17  ;;  %v558_v23 = vsel %vm542_vm0, 1, %v1999_v17  ;;  %v559_v24 = vsel %vm543_vm1, 1, %v1999_v17 }
  0xd1   : > { %v316_v5 = vpop.permute.xlu0 %315  ;;  %v516_v39 = vpop.permute.xlu1 %515 }
  0xd2   : > { %vm338_vm6 = vcmp.eq.s32.totalorder %v316_v5, %v2339_v35  ;;  %vm339_vm7 = vcmp.eq.s32.totalorder %v316_v5, %v2344_v38  ;;  %vm538_vm14 = vcmp.eq.s32.totalorder %v516_v39, %v2339_v35  ;;  %vm539_vm15 = vcmp.eq.s32.totalorder %v516_v39, %v2344_v38 }
  0xd3   : > { %v354_v41 = vsel %vm338_vm6, 1, %v1999_v17  ;;  %v355_v42 = vsel %vm339_vm7, 1, %v1999_v17  ;;  %v554_v3 = vsel %vm538_vm14, 1, %v1999_v17  ;;  %v555_v4 = vsel %vm539_vm15, 1, %v1999_v17 }
  0xd4   : > { %v426_v45 = vadd.s32 %v410_v40, %v354_v41  ;;  %v427_v49 = vadd.s32 %v411_v43, %v355_v42 }
  0xd5   : > { %v319_v50 = vpop.permute.xlu0 %318 }
  0xd6   : > { %vm340_vm10 = vcmp.eq.s32.totalorder %v319_v50, %v2339_v35  ;;  %vm341_vm11 = vcmp.eq.s32.totalorder %v319_v50, %v2344_v38  ;;  %v322_v51 = vpop.permute.xlu1 %321  ;;  %v498_v54 = vadd.s32 %v482_v44, %v426_v45  ;;  %v499_v59 = vadd.s32 %v483_v46, %v427_v49 }
  0xd7   : > { %v356_v52 = vsel %vm340_vm10, 1, %v1999_v17  ;;  %v357_v53 = vsel %vm341_vm11, 1, %v1999_v17  ;;  %vm342_vm2 = vcmp.eq.s32.totalorder %v322_v51, %v2339_v35  ;;  %vm343_vm3 = vcmp.eq.s32.totalorder %v322_v51, %v2344_v38 }
  0xd8   : > { %v428_v55 = vadd.s32 %v412_v47, %v356_v52  ;;  %v429_v56 = vadd.s32 %v413_v48, %v357_v53  ;;  %v570_v6 = vadd.s32 %v554_v3, %v498_v54  ;;  %v571_v9 = vadd.s32 %v555_v4, %v499_v59 }
  0xd9   : > { %v2373_v58 = vpop.permute.xlu0 %330  ;;  %v358_v26 = vsel %vm342_vm2, 1, %v1999_v17  ;;  %v359_v27 = vsel %vm343_vm3, 1, %v1999_v17  ;;  %v2000_v52 = vmov 1.0|1.0  }
  0xda   : > { %v500_v61 = vadd.s32 %v484_v57, %v428_v55  ;;  %v2378_v62 = vpop.permute.xlu1 %324  ;;  %v501_v7 = vadd.s32 %v485_v2, %v429_v56  ;;  %v586_v14 = vcvt.s32.f32 %v570_v6  ;;  %v587_v18 = vcvt.s32.f32 %v571_v9 }
  0xdb   : > { %vm344_vm8 = vcmp.eq.s32.totalorder %v2378_v62, %v2339_v35  ;;  %vm345_vm9 = vcmp.eq.s32.totalorder %v2378_v62, %v2344_v38 }
  0xdc   : > { %v572_v10 = vadd.s32 %v556_v60, %v500_v61  ;;  %v573_v11 = vadd.s32 %v557_v63, %v501_v7  ;;  %v360_v33 = vsel %vm344_vm8, 1, %v1999_v17  ;;  %v361_v44 = vsel %vm345_vm9, 1, %v1999_v17 }
  0xdd   : > { %v2384_v8 = vpop.permute.xlu0 %636 }
  0xde   : > { %v588_v13 = vcvt.s32.f32 %v572_v10  ;;  %v589_v15 = vcvt.s32.f32 %v573_v11 }
  0xdf   : > { %v381_v12 = vpop.permute.xlu1 %380 }
  0xe0   : > { %v602_v19 = vpack.c.bf16 %v588_v13, %v586_v14  ;;  %v603_v20 = vpack.c.bf16 %v589_v15, %v587_v18  ;;  %vm400_vm10 = vcmp.eq.s32.totalorder %v381_v12, %v2339_v35  ;;  %vm401_vm11 = vcmp.eq.s32.totalorder %v381_v12, %v2344_v38 }
  0xe1   : > { %v334_v16 = vpop.permute.xlu0 %333  ;;  %v416_v34 = vsel %vm400_vm10, 1, %v1999_v17  ;;  %v417_v5 = vsel %vm401_vm11, 1, %v1999_v17  ;;  %vm348_vm10 = vcmp.eq.s32.totalorder %v2373_v58, %v2339_v35 }
  0xe2   : > { %930 = vmatprep.mubr.bf16.mxu0 %v603_v20  ;;  %vm350_vm4 = vcmp.eq.s32.totalorder %v334_v16, %v2339_v35  ;;  %vm351_vm5 = vcmp.eq.s32.totalorder %v334_v16, %v2344_v38  ;;  %v432_v48 = vadd.s32 %v416_v34, %v360_v33  ;;  %v433_v49 = vadd.s32 %v417_v5, %v361_v44 }
  0xe3   : > { %931 = vmatmul.mubr.bf16.vlgmr.msra.gmra.mxu0 %v602_v19  ;;  %v366_v22 = vsel %vm350_vm4, 1, %v1999_v17  ;;  %v367_v1 = vsel %vm351_vm5, 1, %v1999_v17  ;;  %v364_v13 = vsel %vm348_vm10, 1, %v1999_v17 }
  0xe4   : > { %v450_v21 = vpop.permute.xlu1 %449 }
  0xe5   : > { %vm470_vm12 = vcmp.eq.s32.totalorder %v450_v21, %v2339_v35  ;;  %vm471_vm13 = vcmp.eq.s32.totalorder %v450_v21, %v2344_v38 }
  0xe6   : > { %v378_v25 = vpop.permute.xlu0 %377  ;;  %v486_v39 = vsel %vm470_vm12, 1, %v1999_v17  ;;  %v487_v43 = vsel %vm471_vm13, 1, %v1999_v17  ;;  %vm349_vm13 = vcmp.eq.s32.totalorder %v2373_v58, %v2344_v38 }
  0xe7   : > { %vm398_vm6 = vcmp.eq.s32.totalorder %v378_v25, %v2339_v35  ;;  %vm399_vm7 = vcmp.eq.s32.totalorder %v378_v25, %v2344_v38  ;;  %v365_v58 = vsel %vm349_vm13, 1, %v1999_v17 }
  0xe8   : > { %v414_v28 = vsel %vm398_vm6, 1, %v1999_v17  ;;  %v415_v29 = vsel %vm399_vm7, 1, %v1999_v17 }
  0xe9   : > { %v628_v30 = vpop.permute.xlu1 %627  ;;  %v430_v0 = vadd.s32 %v414_v28, %v358_v26  ;;  %v431_v32 = vadd.s32 %v415_v29, %v359_v27 }
  0xea   : > { %v390_v31 = vpop.permute.xlu0 %389  ;;  %vm650_vm0 = vcmp.eq.s32.totalorder %v628_v30, %v2339_v35  ;;  %vm651_vm4 = vcmp.eq.s32.totalorder %v628_v30, %v2344_v38 }
  0xeb   : > { %vm406_vm14 = vcmp.eq.s32.totalorder %v390_v31, %v2339_v35  ;;  %vm407_vm15 = vcmp.eq.s32.totalorder %v390_v31, %v2344_v38  ;;  %v502_v45 = vadd.s32 %v486_v39, %v430_v0  ;;  %v503_v46 = vadd.s32 %v487_v43, %v431_v32 }
  0xec   : > { %v422_v36 = vsel %vm406_vm14, 1, %v1999_v17  ;;  %v423_v37 = vsel %vm407_vm15, 1, %v1999_v17  ;;  %vm657_vm14 = vcmp.eq.s32.totalorder %v2384_v8, %v2344_v38 }
  0xed   : > { %v2420_v40 = vadd.s32 %v422_v36, %v366_v22  ;;  %v2422_v41 = vadd.s32 %v423_v37, %v367_v1  ;;  %v631_v42 = vpop.permute.xlu1 %630  ;;  %v575_v56 = vadd.s32 %v559_v24, %v503_v46  ;;  %v574_v57 = vadd.s32 %v558_v23, %v502_v45 }
  0xee   : > { %vm652_vm1 = vcmp.eq.s32.totalorder %v631_v42, %v2339_v35  ;;  %vm653_vm2 = vcmp.eq.s32.totalorder %v631_v42, %v2344_v38 }
  0xef   : > { %vm1668_vm3 = vmpackc.low %vm652_vm1, %vm650_vm0  ;;  %v453_v47 = vpop.permute.xlu0 %452  ;;  %v591_v4 = vcvt.s32.f32 %v575_v56  ;;  %v590_v6 = vcvt.s32.f32 %v574_v57 }
  0xf0   : > { %vm472_vm5 = vcmp.eq.s32.totalorder %v453_v47, %v2339_v35  ;;  %vm473_vm6 = vcmp.eq.s32.totalorder %v453_v47, %v2344_v38  ;;  %vm1666_vm7 = vmpackc.low %vm653_vm2, %vm651_vm4 }
  0xf1   : > { %v488_v50 = vsel %vm472_vm5, 1, %v1999_v17  ;;  %v489_v51 = vsel %vm473_vm6, 1, %v1999_v17  ;;  %1667 = vmatprep.mubr.msk.bf16.mxu1 %vm1666_vm7, %v2000_v52  ;;  %vm656_vm5 = vcmp.eq.s32.totalorder %v2384_v8, %v2339_v35 }
  0xf2   : > { %v504_v53 = vadd.s32 %v488_v50, %v432_v48  ;;  %v505_v54 = vadd.s32 %v489_v51, %v433_v49  ;;  %1669 = vmatmul.mubr.msk.bf16.vlgmr.msra.gmra.mxu1 %vm1668_vm3, %v2000_v52  ;;  %v525_v55 = vpop.permute.xlu1 %524 }
  0xf3   : > { %vm544_vm8 = vcmp.eq.s32.totalorder %v525_v55, %v2339_v35  ;;  %vm545_vm9 = vcmp.eq.s32.totalorder %v525_v55, %v2344_v38  ;;  %v456_v14 = vpop.permute.xlu0 %455 }
  0xf4   : > { %v560_v59 = vsel %vm544_vm8, 1, %v1999_v17  ;;  %v561_v60 = vsel %vm545_vm9, 1, %v1999_v17  ;;  %vm474_vm6 = vcmp.eq.s32.totalorder %v456_v14, %v2339_v35  ;;  %vm475_vm7 = vcmp.eq.s32.totalorder %v456_v14, %v2344_v38 }
  0xf5   : > { %v576_v61 = vadd.s32 %v560_v59, %v504_v53  ;;  %v577_v62 = vadd.s32 %v561_v60, %v505_v54  ;;  %v490_v25 = vsel %vm474_vm6, 1, %v1999_v17  ;;  %v491_v26 = vsel %vm475_vm7, 1, %v1999_v17 }
  0xf7   : > { %v592_v63 = vcvt.s32.f32 %v576_v61  ;;  %v593_v2 = vcvt.s32.f32 %v577_v62  ;;  %v328_v3 = vpop.permute.xlu1 %327  ;;  %v465_v55 = vpop.permute.xlu0 %464 }
  0xf8   : > { %vm346_vm15 = vcmp.eq.s32.totalorder %v328_v3, %v2339_v35  ;;  %vm347_vm0 = vcmp.eq.s32.totalorder %v328_v3, %v2344_v38  ;;  %vm481_vm7 = vcmp.eq.s32.totalorder %v465_v55, %v2344_v38 }
  0xf9   : > { %v605_v7 = vpack.c.bf16 %v593_v2, %v591_v4  ;;  %v604_v9 = vpack.c.bf16 %v592_v63, %v590_v6  ;;  %v362_v19 = vsel %vm346_vm15, 1, %v1999_v17  ;;  %v363_v20 = vsel %vm347_vm0, 1, %v1999_v17 }
  0xfb   : > { %940 = vmatprep.mubr.bf16.mxu0 %v605_v7 }
  0xfc   : > { %941 = vmatmul.mubr.bf16.gmra.mxu0 %v604_v9  ;;  %v384_v10 = vpop.permute.xlu1 %383  ;;  %v534_v59 = vpop.permute.xlu0 %533  ;;  %v497_v9 = vsel %vm481_vm7, 1, %v1999_v17 }
  0xfd   : > { %vm402_vm11 = vcmp.eq.s32.totalorder %v384_v10, %v2339_v35  ;;  %vm403_vm12 = vcmp.eq.s32.totalorder %v384_v10, %v2344_v38 }
  0xfe   : > { %v418_v15 = vsel %vm402_vm11, 1, %v1999_v17  ;;  %v419_v16 = vsel %vm403_vm12, 1, %v1999_v17 }
  0xff   : > { %v434_v21 = vadd.s32 %v418_v15, %v362_v19  ;;  %v435_v23 = vadd.s32 %v419_v16, %v363_v20 }
 0x100   : > { %v387_v11 = vpop.permute.xlu1 %386 }
 0x101   : > { %vm404_vm1 = vcmp.eq.s32.totalorder %v387_v11, %v2339_v35  ;;  %vm405_vm2 = vcmp.eq.s32.totalorder %v387_v11, %v2344_v38  ;;  %v506_v0 = vadd.s32 %v490_v25, %v434_v21  ;;  %v507_v32 = vadd.s32 %v491_v26, %v435_v23 }
 0x102   : > { %v420_v24 = vsel %vm404_vm1, 1, %v1999_v17  ;;  %v421_v8 = vsel %vm405_vm2, 1, %v1999_v17 }
 0x103   : > { %v436_v30 = vadd.s32 %v420_v24, %v364_v13  ;;  %v437_v22 = vadd.s32 %v421_v8, %v365_v58 }
 0x105   : > { %v459_v12 = vpop.permute.xlu1 %458 }
 0x106   : > { %vm476_vm9 = vcmp.eq.s32.totalorder %v459_v12, %v2339_v35  ;;  %vm477_vm10 = vcmp.eq.s32.totalorder %v459_v12, %v2344_v38 }
 0x107   : > { %v492_v28 = vsel %vm476_vm9, 1, %v1999_v17  ;;  %v493_v29 = vsel %vm477_vm10, 1, %v1999_v17  ;;  %vm551_vm9 = vcmp.eq.s32.totalorder %v534_v59, %v2344_v38 }
 0x108   : > { %v508_v33 = vadd.s32 %v492_v28, %v436_v30  ;;  %v509_v34 = vadd.s32 %v493_v29, %v437_v22  ;;  %v567_v13 = vsel %vm551_vm9, 1, %v1999_v17 }
 0x10a   : > { %v634_v18 = vpop.permute.xlu1 %633 }
 0x10b   : > { %vm654_vm3 = vcmp.eq.s32.totalorder %v634_v18, %v2339_v35  ;;  %vm655_vm4 = vcmp.eq.s32.totalorder %v634_v18, %v2344_v38 }
 0x10c   : > { %vm1670_vm8 = vmpackc.low %vm657_vm14, %vm655_vm4 }
 0x10d   : > { %vm1672_vm11 = vmpackc.low %vm656_vm5, %vm654_vm3  ;;  %1671 = vmatprep.mubr.msk.bf16.mxu1 %vm1670_vm8, %v2000_v52  ;;  %vm480_vm3 = vcmp.eq.s32.totalorder %v465_v55, %v2339_v35  ;;  %vm550_vm8 = vcmp.eq.s32.totalorder %v534_v59, %v2339_v35 }
 0x10e   : > { %1673 = vmatmul.mubr.msk.bf16.gmra.mxu1 %vm1672_vm11, %v2000_v52  ;;  %v496_v62 = vsel %vm480_vm3, 1, %v1999_v17  ;;  %v566_v12 = vsel %vm550_vm8, 1, %v1999_v17 }
 0x10f   : > { %v528_v27 = vpop.permute.xlu1 %527 }
 0x110   : > { %vm546_vm12 = vcmp.eq.s32.totalorder %v528_v27, %v2339_v35  ;;  %vm547_vm13 = vcmp.eq.s32.totalorder %v528_v27, %v2344_v38 }
 0x111   : > { %v562_v1 = vsel %vm546_vm12, 1, %v1999_v17  ;;  %v563_v31 = vsel %vm547_vm13, 1, %v1999_v17 }
 0x112   : > { %v578_v37 = vadd.s32 %v562_v1, %v506_v0  ;;  %v579_v5 = vadd.s32 %v563_v31, %v507_v32 }
 0x113   : > { %v531_v36 = vpop.permute.xlu1 %530 }
 0x114   : > { %vm548_vm14 = vcmp.eq.s32.totalorder %v531_v36, %v2339_v35  ;;  %vm549_vm15 = vcmp.eq.s32.totalorder %v531_v36, %v2344_v38  ;;  %v594_v45 = vcvt.s32.f32 %v578_v37  ;;  %v595_v46 = vcvt.s32.f32 %v579_v5 }
 0x115   : > { %v564_v39 = vsel %vm548_vm14, 1, %v1999_v17  ;;  %v565_v42 = vsel %vm549_vm15, 1, %v1999_v17 }
 0x116   : > { %v580_v43 = vadd.s32 %v564_v39, %v508_v33  ;;  %v581_v44 = vadd.s32 %v565_v42, %v509_v34 }
 0x118   : > { %v596_v47 = vcvt.s32.f32 %v580_v43  ;;  %v597_v48 = vcvt.s32.f32 %v581_v44  ;;  %v337_v49 = vpop.permute.xlu1 %336 }
 0x119   : > { %vm352_vm2 = vcmp.eq.s32.totalorder %v337_v49, %v2339_v35  ;;  %vm353_vm6 = vcmp.eq.s32.totalorder %v337_v49, %v2344_v38 }
 0x11a   : > { %v607_v50 = vpack.c.bf16 %v597_v48, %v595_v46  ;;  %v606_v51 = vpack.c.bf16 %v596_v47, %v594_v45  ;;  %v368_v61 = vsel %vm352_vm2, 1, %v1999_v17  ;;  %v369_v3 = vsel %vm353_vm6, 1, %v1999_v17 }
 0x11c   : > { %950 = vmatprep.mubr.bf16.mxu0 %v607_v50 }
 0x11d   : > { %951 = vmatmul.mubr.bf16.gmra.mxu0 %v606_v51  ;;  %v393_v53 = vpop.permute.xlu1 %392 }
 0x11e   : > { %vm408_vm0 = vcmp.eq.s32.totalorder %v393_v53, %v2339_v35  ;;  %vm409_vm1 = vcmp.eq.s32.totalorder %v393_v53, %v2344_v38 }
 0x11f   : > { %v424_v57 = vsel %vm408_vm0, 1, %v1999_v17  ;;  %v425_v60 = vsel %vm409_vm1, 1, %v1999_v17 }
 0x120   : > { %v440_v4 = vadd.s32 %v424_v57, %v368_v61  ;;  %v441_v7 = vadd.s32 %v425_v60, %v369_v3 }
 0x122   : > { %v462_v54 = vpop.permute.xlu1 %461  ;;  %v512_v14 = vadd.s32 %v496_v62, %v440_v4  ;;  %v513_v15 = vadd.s32 %v497_v9, %v441_v7 }
 0x123   : > { %vm478_vm4 = vcmp.eq.s32.totalorder %v462_v54, %v2339_v35  ;;  %vm479_vm5 = vcmp.eq.s32.totalorder %v462_v54, %v2344_v38 }
 0x124   : > { %v494_v63 = vsel %vm478_vm4, 1, %v1999_v17  ;;  %v495_v2 = vsel %vm479_vm5, 1, %v1999_v17 }
 0x125   : > { %v510_v10 = vadd.s32 %v494_v63, %v2420_v40  ;;  %v511_v11 = vadd.s32 %v495_v2, %v2422_v41  ;;  %v649_v40 = vpop.permute.xlu0 %648 }
 0x126   : > { %vm664_vm2 = vcmp.eq.s32.totalorder %v649_v40, %v2339_v35  ;;  %vm665_vm3 = vcmp.eq.s32.totalorder %v649_v40, %v2344_v38 }
 0x127   : > { %v640_v56 = vpop.permute.xlu1 %639  ;;  %v582_v18 = vadd.s32 %v566_v12, %v510_v10  ;;  %v583_v58 = vadd.s32 %v567_v13, %v511_v11 }
 0x128   : > { %vm659_vm10 = vcmp.eq.s32.totalorder %v640_v56, %v2344_v38  ;;  %vm658_vm13 = vcmp.eq.s32.totalorder %v640_v56, %v2339_v35 }
 0x129   : > { %v598_v23 = vcvt.s32.f32 %v582_v18  ;;  %v599_v24 = vcvt.s32.f32 %v583_v58 }
 0x12b   : > { %v643_v6 = vpop.permute.xlu1 %642 }
 0x12c   : > { %vm660_vm11 = vcmp.eq.s32.totalorder %v643_v6, %v2339_v35  ;;  %vm661_vm12 = vcmp.eq.s32.totalorder %v643_v6, %v2344_v38 }
 0x12d   : > { %vm1674_vm14 = vmpackc.low %vm661_vm12, %vm659_vm10  ;;  %vm1436_vm10 = vcmask 7168  }
 0x12e   : > { %vm1676_vm15 = vmpackc.low %vm660_vm11, %vm658_vm13  ;;  %1675 = vmatprep.mubr.msk.bf16.mxu1 %vm1674_vm14, %v2000_v52 }
 0x12f   : > { %1677 = vmatmul.mubr.msk.bf16.gmra.mxu1 %vm1676_vm15, %v2000_v52 }
 0x130   : > { %v537_v16 = vpop.permute.xlu1 %536 }
 0x131   : > { %vm552_vm0 = vcmp.eq.s32.totalorder %v537_v16, %v2339_v35  ;;  %vm553_vm1 = vcmp.eq.s32.totalorder %v537_v16, %v2344_v38 }
 0x132   : > { %v568_v41 = vsel %vm552_vm0, 1, %v1999_v17  ;;  %v569_v19 = vsel %vm553_vm1, 1, %v1999_v17 }
 0x133   : > { %v584_v20 = vadd.s32 %v568_v41, %v512_v14  ;;  %v585_v21 = vadd.s32 %v569_v19, %v513_v15 }
 0x135   : > { %v600_v8 = vcvt.s32.f32 %v584_v20  ;;  %v601_v25 = vcvt.s32.f32 %v585_v21  ;;  %v646_v26 = vpop.permute.xlu1 %645 }
 0x136   : > { %vm662_vm4 = vcmp.eq.s32.totalorder %v646_v26, %v2339_v35  ;;  %vm663_vm5 = vcmp.eq.s32.totalorder %v646_v26, %v2344_v38 }
 0x137   : > { %vm1678_vm6 = vmpackc.low %vm665_vm3, %vm663_vm5  ;;  %v609_v27 = vpack.c.bf16 %v601_v25, %v599_v24  ;;  %v608_v28 = vpack.c.bf16 %v600_v8, %v598_v23  ;;  %v2531_v25 = vld [vmem:[%s2137_s29] sm:$0xff] }
 0x138   : > { %vm1680_vm7 = vmpackc.low %vm664_vm2, %vm662_vm4  ;;  %1679 = vmatprep.mubr.msk.bf16.mxu1 %vm1678_vm6, %v2000_v52 }
 0x139   : > { %960 = vmatprep.mubr.bf16.mxu0 %v609_v27  ;;  %1681 = vmatmul.mubr.msk.bf16.gmra.mxu1 %vm1680_vm7, %v2000_v52  ;;  %v2534_v27 = vld [vmem:[%s2137_s29 + $0x8] sm:$0xff] }
 0x13a   : > { %961 = vmatmul.mubr.bf16.gmra.mxu0 %v608_v28 }
 0x1a3   : > { %v932_v17 = vpop.f32.mrf.mxu0 }
 0x1a5   : > { %v934_v29 = vpop.f32.mrf.mxu0 }
 0x1a7   : > { %v936_v22 = vpop.f32.mrf.mxu0 }
 0x1a9   : > { %v938_v38 = vpop.f32.mrf.mxu0 }
 0x1b2   : > { %v1197_v30 = vpop.f32.mrf.mxu1 }
 0x1b3   : > { %v1236_v31 = vmul.f32 %v1197_v30, %v932_v17 }
 0x1b4   : > { %v1199_v1 = vpop.f32.mrf.mxu1 }
 0x1b5   : > { %v1237_v0 = vmul.f32 %v1199_v1, %v934_v29  ;;  %v2537_v29 = vld [vmem:[%s2137_s29 + $0x10] sm:$0xff] }
 0x1b6   : > { %v1201_v35 = vpop.f32.mrf.mxu1 }
 0x1b7   : > { %v1252_v32 = vadd.f32 %v1237_v0, %v1236_v31  ;;  %v1238_v34 = vmul.f32 %v1201_v35, %v936_v22  ;;  %v2549_v0 = vld [vmem:[%s2137_s29 + $0x18] sm:$0xff] }
 0x1b8   : > { %v1203_v33 = vpop.f32.mrf.mxu1 }
 0x1b9   : > { %v1239_v36 = vmul.f32 %v1203_v33, %v938_v38  ;;  %1253 = vadd.xlane.f32.xlu1 %v1252_v32 }
 0x1bb   : > { %v1255_v37 = vadd.f32 %v1239_v36, %v1238_v34 }
 0x1bc   : > { %v942_v5 = vpop.f32.mrf.mxu0 }
 0x1bd   : > { %1256 = vadd.xlane.f32.xlu0 %v1255_v37 }
 0x1be   : > { %v944_v39 = vpop.f32.mrf.mxu0 }
 0x1c0   : > { %v946_v42 = vpop.f32.mrf.mxu0 }
 0x1c2   : > { %v948_v48 = vpop.f32.mrf.mxu0 }
 0x1ce   : > { %v1207_v52 = vpop.f32.mrf.mxu1 }
 0x1cf   : > { %v1240_v44 = vmul.f32 %v1207_v52, %v942_v5 }
 0x1d0   : > { %v1209_v43 = vpop.f32.mrf.mxu1 }
 0x1d1   : > { %v1241_v45 = vmul.f32 %v1209_v43, %v944_v39 }
 0x1d2   : > { %v1211_v46 = vpop.f32.mrf.mxu1 }
 0x1d3   : > { %v1258_v47 = vadd.f32 %v1241_v45, %v1240_v44  ;;  %v1242_v50 = vmul.f32 %v1211_v46, %v946_v42  ;;  %v2559_v45 = vld [vmem:[%s2137_s29 + $0x20] sm:$0xff] }
 0x1d4   : > { %v1213_v49 = vpop.f32.mrf.mxu1 }
 0x1d5   : > { %v1243_v51 = vmul.f32 %v1213_v49, %v948_v48  ;;  %1259 = vadd.xlane.f32.xlu1 %v1258_v47  ;;  %v2565_v49 = vld [vmem:[%s2137_s29 + $0x28] sm:$0xff] }
 0x1d7   : > { %v1261_v53 = vadd.f32 %v1243_v51, %v1242_v50 }
 0x1d9   : > { %1262 = vadd.xlane.f32.xlu0 %v1261_v53 }
 0x1dd   : > { %v952_v54 = vpop.f32.mrf.mxu0 }
 0x1df   : > { %v954_v55 = vpop.f32.mrf.mxu0 }
 0x1e1   : > { %v956_v57 = vpop.f32.mrf.mxu0 }
 0x1e3   : > { %v958_v2 = vpop.f32.mrf.mxu0 }
 0x1ef   : > { %v1217_v56 = vpop.f32.mrf.mxu1 }
 0x1f0   : > { %v1244_v60 = vmul.f32 %v1217_v56, %v952_v54 }
 0x1f1   : > { %v1219_v59 = vpop.f32.mrf.mxu1 }
 0x1f2   : > { %v1245_v61 = vmul.f32 %v1219_v59, %v954_v55  ;;  %v2573_v59 = vld [vmem:[%s2137_s29 + $0x30] sm:$0xff] }
 0x1f3   : > { %v1221_v62 = vpop.f32.mrf.mxu1 }
 0x1f4   : > { %v1264_v63 = vadd.f32 %v1245_v61, %v1244_v60  ;;  %v1246_v4 = vmul.f32 %v1221_v62, %v956_v57 }
 0x1f5   : > { %v1223_v3 = vpop.f32.mrf.mxu1 }
 0x1f6   : > { %v1247_v6 = vmul.f32 %v1223_v3, %v958_v2  ;;  %1265 = vadd.xlane.f32.xlu1 %v1264_v63 }
 0x1f8   : > { %v1267_v7 = vadd.f32 %v1247_v6, %v1246_v4 }
 0x1f9   : > { %v1227_v9 = vpop.f32.mrf.mxu1 }
 0x1fa   : > { %1268 = vadd.xlane.f32.xlu0 %v1267_v7  ;;  %v962_v10 = vpop.f32.mrf.mxu0 }
 0x1fb   : > { %v1229_v11 = vpop.f32.mrf.mxu1  ;;  %v1248_v13 = vmul.f32 %v1227_v9, %v962_v10 }
 0x1fc   : > { %v964_v12 = vpop.f32.mrf.mxu0 }
 0x1fd   : > { %v1249_v14 = vmul.f32 %v1229_v11, %v964_v12  ;;  %v1231_v15 = vpop.f32.mrf.mxu1  ;;  %v2585_v12 = vld [vmem:[%s2137_s29 + $0x38] sm:$0xff]  ;;  %s1577_s29 = sshll.u32 %s2726_s22, 3 }
 0x1fe   : > { %v966_v16 = vpop.f32.mrf.mxu0  ;;  %s302_s26 = scalar_lea.vmem %s2699_s5, %s1577_s29 }
 0x1ff   : > { %v1233_v18 = vpop.f32.mrf.mxu1  ;;  %v1270_v58 = vadd.f32 %v1249_v14, %v1248_v13  ;;  %v1250_v41 = vmul.f32 %v1231_v15, %v966_v16 }
 0x200   : > { %v968_v40 = vpop.f32.mrf.mxu0 }
 0x201   : > { %v1251_v19 = vmul.f32 %v1233_v18, %v968_v40  ;;  %1271 = vadd.xlane.f32.xlu1 %v1270_v58 }
 0x203   : > { %v1273_v20 = vadd.f32 %v1251_v19, %v1250_v41 }
 0x205   : > { %1274 = vadd.xlane.f32.xlu0 %v1273_v20 }
 0x242   : > { %v1254_v21 = vpop.xlane.xlu1 %1253 }
 0x243   : > { %v1284_v8 = vmul.f32 0.25, %v1254_v21 }
 0x245   : > { %v2540_v30 = vmul.f32 %v1284_v8, %v2531_v25 }
 0x246   : > { %v1257_v23 = vpop.xlane.xlu0 %1256 }
 0x247   : > { %v1285_v26 = vmul.f32 0.25, %v1257_v23  ;;  %v1308_v35 = vand.u32 2147483647, %v2540_v30 }
 0x249   : > { %v2543_v22 = vmul.f32 %v1285_v26, %v2534_v27  ;;  %v1316_v34 = vsub.f32 0.0, %v1308_v35 }
 0x24b   : > { %v1309_v32 = vand.u32 2147483647, %v2543_v22  ;;  %v1324_v39 = vmul.f32 1.442695, %v1316_v34 }
 0x24d   : > { %v1317_v36 = vsub.f32 0.0, %v1309_v32  ;;  %1866 = vpow2.f32 %v1324_v39 }
 0x24f   : > { %v1326_v52 = vmul.f32 1.442695, %v1317_v36 }
 0x251   : > { %1868 = vpow2.f32 %v1326_v52 }
 0x25a   : > { %v1867_v61 = vpop.eup %1866 }
 0x25b   : > { %v1340_v7 = vadd.f32 1.0, %v1867_v61  ;;  %v1343_v8 = vmul.f32 -0.5, %v1867_v61 }
 0x25d   : > { %v1344_v32 = vadd.f32 1.0, %v1343_v8 }
 0x25e   : > { %v1260_v24 = vpop.xlane.xlu1 %1259  ;;  %v2575_v2 = vpop.eup %1868 }
 0x25f   : > { %v1286_v28 = vmul.f32 0.25, %v1260_v24  ;;  %v1349_v10 = vadd.f32 1.0, %v2575_v2  ;;  %v1352_v26 = vmul.f32 -0.5, %v2575_v2 }
 0x261   : > { %v2546_v31 = vmul.f32 %v1286_v28, %v2537_v29  ;;  %v1353_v39 = vadd.f32 1.0, %v1352_v26 }
 0x262   : > { %v1263_v17 = vpop.xlane.xlu0 %1262 }
 0x263   : > { %v1287_v1 = vmul.f32 0.25, %v1263_v17  ;;  %v1310_v33 = vand.u32 2147483647, %v2546_v31 }
 0x265   : > { %v2554_v38 = vmul.f32 %v1287_v1, %v2549_v0  ;;  %v1318_v5 = vsub.f32 0.0, %v1310_v33  ;;  %v1346_v33 = vand.u32 2147483647, %v1867_v61 }
 0x267   : > { %v1311_v37 = vand.u32 2147483647, %v2554_v38  ;;  %v1328_v43 = vmul.f32 1.442695, %v1318_v5  ;;  %v1421_v5 = vand.u32 2147483647, %v2534_v27 }
 0x268   : > { %vm2612_vm8 = vcmp.lt.f32.partialorder %v1346_v33, 0.0004427343  ;;  %v1423_v33 = vand.u32 2147483647, %v2549_v0 }
 0x269   : > { %v1319_v42 = vsub.f32 0.0, %v1311_v37  ;;  %1870 = vpow2.f32 %v1328_v43  ;;  %v1420_v37 = vand.u32 2147483647, %v2531_v25 }
 0x26b   : > { %v1330_v44 = vmul.f32 1.442695, %v1319_v42  ;;  %v1300_v42 = vmin.f32 %v2540_v30, 0.0  ;;  %v1354_v30 = vmul.f32 %v2575_v2, %v1353_v39 }
 0x26d   : > { %1872 = vpow2.f32 %v1330_v44  ;;  %v1355_v44 = vand.u32 2147483647, %v2575_v2 }
 0x26f   : > { %vm2622_vm9 = vcmp.lt.f32.partialorder %v1355_v44, 0.0004427343 }
 0x276   : > { %v2577_v3 = vpop.eup %1870 }
 0x277   : > { %v1358_v14 = vadd.f32 1.0, %v2577_v3  ;;  %v1361_v1 = vmul.f32 -0.5, %v2577_v3  ;;  %v1364_v27 = vand.u32 2147483647, %v2577_v3 }
 0x279   : > { %vm2633_vm11 = vcmp.lt.f32.partialorder %v1364_v27, 0.0004427343 }
 0x27a   : > { %v2587_v13 = vpop.eup %1872 }
 0x27b   : > { %v1367_v58 = vadd.f32 1.0, %v2587_v13  ;;  %v1370_v34 = vmul.f32 -0.5, %v2587_v13 }
 0x27f   : > { %v1266_v46 = vpop.xlane.xlu1 %1265 }
 0x280   : > { %v1288_v47 = vmul.f32 0.25, %v1266_v46 }
 0x282   : > { %v2562_v48 = vmul.f32 %v1288_v47, %v2559_v45  ;;  %v1362_v47 = vadd.f32 1.0, %v1361_v1  ;;  %v1422_v1 = vand.u32 2147483647, %v2537_v29 }
 0x283   : > { %v1269_v50 = vpop.xlane.xlu0 %1268 }
 0x284   : > { %v1312_v51 = vand.u32 2147483647, %v2562_v48  ;;  %v1289_v53 = vmul.f32 0.25, %v1269_v50  ;;  %v1363_v2 = vmul.f32 %v2577_v3, %v1362_v47 }
 0x286   : > { %v1320_v54 = vsub.f32 0.0, %v1312_v51  ;;  %v2569_v55 = vmul.f32 %v1289_v53, %v2565_v49 }
 0x288   : > { %v1332_v56 = vmul.f32 1.442695, %v1320_v54  ;;  %v1313_v57 = vand.u32 2147483647, %v2569_v55  ;;  %v1345_v54 = vmul.f32 %v1867_v61, %v1344_v32  ;;  %v1303_v32 = vmin.f32 %v2554_v38, 0.0 }
 0x289   : > { %v1305_v38 = vmin.f32 %v2569_v55, 0.0 }
 0x28a   : > { %1874 = vpow2.f32 %v1332_v56  ;;  %v1272_v60 = vpop.xlane.xlu1 %1271  ;;  %v1321_v62 = vsub.f32 0.0, %v1313_v57  ;;  %v1371_v56 = vadd.f32 1.0, %v1370_v34 }
 0x28b   : > { %v1290_v63 = vmul.f32 0.25, %v1272_v60 }
 0x28c   : > { %v1334_v4 = vmul.f32 1.442695, %v1321_v62 }
 0x28d   : > { %v2580_v6 = vmul.f32 %v1290_v63, %v2573_v59  ;;  %v1301_v63 = vmin.f32 %v2543_v22, 0.0 }
 0x28e   : > { %v1275_v9 = vpop.xlane.xlu0 %1274  ;;  %1876 = vpow2.f32 %v1334_v4  ;;  %v1373_v4 = vand.u32 2147483647, %v2587_v13 }
 0x28f   : > { %v1314_v11 = vand.u32 2147483647, %v2580_v6  ;;  %v1291_v15 = vmul.f32 0.25, %v1275_v9  ;;  %1878 = vlog2.f32 %v1340_v7 }
 0x290   : > { %1880 = vlog2.f32 %v1349_v10  ;;  %vm2642_vm12 = vcmp.lt.f32.partialorder %v1373_v4, 0.0004427343 }
 0x291   : > { %v1322_v16 = vsub.f32 0.0, %v1314_v11  ;;  %v2591_v18 = vmul.f32 %v1291_v15, %v2585_v12  ;;  %1882 = vlog2.f32 %v1358_v14  ;;  %v1302_v15 = vmin.f32 %v2546_v31, 0.0 }
 0x293   : > { %v1336_v40 = vmul.f32 1.442695, %v1322_v16  ;;  %v1315_v41 = vand.u32 2147483647, %v2591_v18  ;;  %v1372_v16 = vmul.f32 %v2587_v13, %v1371_v56  ;;  %v1307_v22 = vmin.f32 %v2591_v18, 0.0 }
 0x295   : > { %1884 = vpow2.f32 %v1336_v40  ;;  %v1323_v19 = vsub.f32 0.0, %v1315_v41 }
 0x296   : > { %1886 = vlog2.f32 %v1367_v58 }
 0x297   : > { %v2595_v20 = vpop.eup %1874  ;;  %v1338_v23 = vmul.f32 1.442695, %v1323_v19 }
 0x298   : > { %v1376_v21 = vadd.f32 1.0, %v2595_v20  ;;  %v1379_v50 = vmul.f32 -0.5, %v2595_v20  ;;  %v1382_v58 = vand.u32 2147483647, %v2595_v20 }
 0x29a   : > { %1888 = vlog2.f32 %v1376_v21  ;;  %v1380_v11 = vadd.f32 1.0, %v1379_v50  ;;  %vm1383_vm13 = vcmp.lt.f32.partialorder %v1382_v58, 0.0004427343 }
 0x29b   : > { %1890 = vpow2.f32 %v1338_v23  ;;  %v2598_v24 = vpop.eup %1876 }
 0x29c   : > { %v1385_v28 = vadd.f32 1.0, %v2598_v24  ;;  %v1879_v17 = vpop.eup %1878  ;;  %v1388_v60 = vmul.f32 -0.5, %v2598_v24  ;;  %v1391_v31 = vand.u32 2147483647, %v2598_v24  ;;  %v1381_v26 = vmul.f32 %v2595_v20, %v1380_v11 }
 0x29d   : > { %v1881_v35 = vpop.eup %1880  ;;  %v1342_v43 = vmul.f32 0.6931472, %v1879_v17  ;;  %v1304_v20 = vmin.f32 %v2562_v48, 0.0  ;;  %v1425_v48 = vand.u32 2147483647, %v2565_v49 }
 0x29e   : > { %1892 = vlog2.f32 %v1385_v28  ;;  %v1883_v36 = vpop.eup %1882  ;;  %v1351_v46 = vmul.f32 0.6931472, %v1881_v35  ;;  %v1389_v3 = vadd.f32 1.0, %v1388_v60  ;;  %vm1392_vm14 = vcmp.lt.f32.partialorder %v1391_v31, 0.0004427343 }
 0x29f   : > { %v1360_v57 = vmul.f32 0.6931472, %v1883_v36  ;;  %v1348_v62 = vsel %vm2612_vm8, %v1345_v54, %v1342_v43 }
 0x2a0   : > { %v1357_v9 = vsel %vm2622_vm9, %v1354_v30, %v1351_v46  ;;  %v1412_v21 = vsub.f32 %v1300_v42, %v1348_v62  ;;  %v1390_v39 = vmul.f32 %v2598_v24, %v1389_v3  ;;  %v1424_v46 = vand.u32 2147483647, %v2559_v45 }
 0x2a1   : > { %v1366_v40 = vsel %vm2633_vm11, %v1363_v2, %v1360_v57  ;;  %v1413_v23 = vsub.f32 %v1301_v63, %v1357_v9  ;;  %v1426_v45 = vand.u32 2147483647, %v2573_v59  ;;  %v1306_v57 = vmin.f32 %v2580_v6, 0.0 }
 0x2a2   : > { %v2606_v52 = vpop.eup %1884  ;;  %v1414_v35 = vsub.f32 %v1302_v15, %v1366_v40  ;;  %v1428_v44 = vmul.f32 %v1420_v37, %v1412_v21  ;;  %v1427_v6 = vand.u32 2147483647, %v2585_v12 }
 0x2a3   : > { %v1394_v51 = vadd.f32 1.0, %v2606_v52  ;;  %v1887_v53 = vpop.eup %1886  ;;  %v1397_v28 = vmul.f32 -0.5, %v2606_v52  ;;  %v1429_v42 = vmul.f32 %v1421_v5, %v1413_v23  ;;  %v1400_v0 = vand.u32 2147483647, %v2606_v52 }
 0x2a4   : > { %v1369_v10 = vmul.f32 0.6931472, %v1887_v53  ;;  %v1430_v50 = vmul.f32 %v1422_v1, %v1414_v35  ;;  %v1437_v37 = vsel %vm1436_vm10, %v1428_v44, 0.0 }
 0x2a5   : > { %1894 = vlog2.f32 %v1394_v51  ;;  %v1398_v29 = vadd.f32 1.0, %v1397_v28  ;;  %v1438_v24 = vsel %vm1436_vm10, %v1429_v42, 0.0  ;;  %vm1401_vm15 = vcmp.lt.f32.partialorder %v1400_v0, 0.0004427343 }
 0x2a6   : > { %v1375_v13 = vsel %vm2642_vm12, %v1372_v16, %v1369_v10  ;;  %v1440_v55 = vsel %vm1436_vm10, %v1430_v50, 0.0  ;;  %v1439_v60 = vadd.f32 %v1438_v24, %v1437_v37 }
 0x2a7   : > { %v1889_v7 = vpop.eup %1888  ;;  %v1415_v43 = vsub.f32 %v1303_v32, %v1375_v13  ;;  %v1399_v56 = vmul.f32 %v2606_v52, %v1398_v29 }
 0x2a8   : > { %v2630_v14 = vpop.eup %1890  ;;  %v1378_v41 = vmul.f32 0.6931472, %v1889_v7  ;;  %v1441_v9 = vadd.f32 %v1440_v55, %v1439_v60 }
 0x2a9   : > { %v1403_v19 = vadd.f32 1.0, %v2630_v14  ;;  %v1406_v53 = vmul.f32 -0.5, %v2630_v14  ;;  %v1431_v5 = vmul.f32 %v1423_v33, %v1415_v43  ;;  %v1409_v7 = vand.u32 2147483647, %v2630_v14 }
 0x2aa   : > { %v1384_v34 = vsel %vm1383_vm13, %v1381_v26, %v1378_v41 }
 0x2ab   : > { %1896 = vlog2.f32 %v1403_v19  ;;  %v1893_v17 = vpop.eup %1892  ;;  %v1416_v51 = vsub.f32 %v1304_v20, %v1384_v34  ;;  %v1407_v63 = vadd.f32 1.0, %v1406_v53  ;;  %v1442_v61 = vsel %vm1436_vm10, %v1431_v5, 0.0 }
 0x2ac   : > { %v1387_v36 = vmul.f32 0.6931472, %v1893_v17  ;;  %v1443_v15 = vadd.f32 %v1442_v61, %v1441_v9  ;;  %vm1410_vm0 = vcmp.lt.f32.partialorder %v1409_v7, 0.0004427343 }
 0x2ad   : > { %v1432_v30 = vmul.f32 %v1424_v46, %v1416_v51  ;;  %v1408_v11 = vmul.f32 %v2630_v14, %v1407_v63 }
 0x2ae   : > { %v1393_v47 = vsel %vm1392_vm14, %v1390_v39, %v1387_v36 }
 0x2af   : > { %v1417_v25 = vsub.f32 %v1305_v38, %v1393_v47  ;;  %v1444_v52 = vsel %vm1436_vm10, %v1432_v30, 0.0 }
 0x2b0   : > { %v1445_v40 = vadd.f32 %v1444_v52, %v1443_v15 }
 0x2b1   : > { %v1433_v49 = vmul.f32 %v1425_v48, %v1417_v25 }
 0x2b2   : > { %v1895_v54 = vpop.eup %1894 }
 0x2b3   : > { %v1396_v27 = vmul.f32 0.6931472, %v1895_v54  ;;  %v1446_v16 = vsel %vm1436_vm10, %v1433_v49, 0.0 }
 0x2b4   : > { %v1447_v19 = vadd.f32 %v1446_v16, %v1445_v40 }
 0x2b5   : > { %v1402_v62 = vsel %vm1401_vm15, %v1399_v56, %v1396_v27 }
 0x2b6   : > { %v1418_v4 = vsub.f32 %v1306_v57, %v1402_v62 }
 0x2b8   : > { %v1897_v59 = vpop.eup %1896  ;;  %v1434_v2 = vmul.f32 %v1426_v45, %v1418_v4 }
 0x2b9   : > { %v1405_v10 = vmul.f32 0.6931472, %v1897_v59 }
 0x2ba   : > { %v1448_v3 = vsel %vm1436_vm10, %v1434_v2, 0.0 }
 0x2bb   : > { %v1411_v58 = vsel %vm1410_vm0, %v1408_v11, %v1405_v10  ;;  %v1449_v23 = vadd.f32 %v1448_v3, %v1447_v19 }
 0x2bc   : > { %v1419_v41 = vsub.f32 %v1307_v22, %v1411_v58 }
 0x2be   : > { %v1435_v21 = vmul.f32 %v1427_v6, %v1419_v41 }
 0x2c0   : > { %v1450_v14 = vsel %vm1436_vm10, %v1435_v21, 0.0 }
 0x2c1   : > { %v1451_v8 = vadd.f32 %v1450_v14, %v1449_v23 }
 0x2c3   : > { %1452 = vadd.xlane.f32.xlu1 %v1451_v8 }
 0x34c   : > { %v1453_v12 = vpop.xlane.xlu1 %1452 }
 0x34d   : > { %v1454_v31 = vrot.slane %v1453_v12, 4 }
 0x34f   : > { %v1455_v18 = vadd.f32 %v1454_v31, %v1453_v12 }
 0x351   : > { %v1456_v13 = vrot.slane %v1455_v18, 2 }
 0x353   : > { %v1457_v26 = vadd.f32 %v1456_v13, %v1455_v18 }
 0x355   : > { %v1458_v28 = vrot.slane %v1457_v26, 1 }
 0x357   : > { %v1459_v17 = vadd.f32 %v1458_v28, %v1457_v26 }
 0x359   : > { %1685 = vpush %v1459_v17 }
 0x38a   : > { %s1686_s25 = spop %1685 }
 0x38b   : > { %s1461_s27 = ssub.f32 0.0, %s1686_s25 }
 0x38d   : > { %v1462_v1 = vstv %s1461_s27 }
 0x38e   : > { %1463 = vst [vmem:[%s302_s26] sm:$0xff] %v1462_v1 }
 0x38f PF: > { %p16_p2 = scmp.ge.s32.totalorder %s2075_s28, 4   ;;  %s2719_s18 = smov %s1982_s19 }
 0x390   : > { %s2720_s19 = smov %s1986_s20  ;;  %s2721_s20 = smov %s2095_s11 }
 0x391   : > { %s2722_s21 = smov %s2075_s28  ;;  %18 = sbr.rel (!%p16_p2) target bundleno = 4 (0x4), region = 90 }
 0x396   :  { %1483 = vsyncpa [#allocation3], 1 }
 0x397   :  { %1485 = vsyncpa [#allocation3 + $0x1], 1 }
 0x398   :  { %1486 = vsyncpa [#allocation5], 1 }

// kernel: word2vec_loss.1
= control target key start
LH: loop header
LB: loop body
LE: loop exit
PB: predicated region body
PF: predicated region fallthrough
CT: control target
= control target key end

     0   :  { %10 = vsyncpa [#allocation3], 0  ;;  %s2694_s0 = inlined_call_operand.vmem [shape: s32[128,4], index: 0, kind: input, shape index: {}]   ;;  %s2695_s1 = inlined_call_operand.vmem [shape: s32[128,1], index: 1, kind: input, shape index: {}]   ;;  %s2696_s2 = inlined_call_operand.hbm [shape: f32[128,1], index: 2, kind: input, shape index: {}]   ;;  %s2697_s3 = inlined_call_operand.vmem [shape: bf16[256,256], index: 3, kind: input, shape index: {}]   ;;  %s2698_s4 = inlined_call_operand.hbm [shape: bf16[256,256], index: 4, kind: input, shape index: {}]   ;;  %s2699_s5 = inlined_call_operand.vmem [shape: f32[2,8,128], index: 5, kind: output, shape index: {}]  }
   0x1   :  { %12 = vsyncpa [#allocation3 + $0x1], 0 }
   0x2   :  { %13 = vsyncpa [#allocation5], 0  ;;  %s2031_s18 = smov 0   ;;  %s2033_s19 = smov 0  }
   0x3   :  { %s2035_s20 = smov 0   ;;  %s2037_s21 = smov 0  }
   0x4 LB: > { %s2050_s22 = sadd.s32 4294967295, %s1990_s21   ;;  %p91_p0 = scmp.ne.s32.totalorder %s1982_s19, %s1978_s18  ;;  %s1990_s21 = sphi %s2037_s21, %s2722_s21   ;;  %s1986_s20 = sphi %s2035_s20, %s2721_s20   ;;  %s1982_s19 = sphi %s2033_s19, %s2720_s19   ;;  %s1978_s18 = sphi %s2031_s18, %s2719_s18  }
   0x5   : > { %p2700_p1 = scmp.eq.s32.totalorder %s2050_s22, 0  ;;  %p1564_p2 = scmp.ge.s32.totalorder %s1990_s21, 1 }
   0x6   : > { %p170_p3 = scmp.lt.s32.totalorder %s1990_s21, 3  ;;  %s1992_s25 = smov [#allocation4]  }
   0x7   : > { %p2058_p4 = por %p2700_p1, %p91_p0  ;;  %s185_s26 = sshll.u32 %s1992_s25, 4  ;;  %s186_s26 = int_to_ptr.vmem [resolvable:$true] %s185_s26 }
   0x8   : > { %p2062_p5 = pnand %p1564_p2, %p170_p3  ;;  %s2075_s28 = sadd.s32 1, %s1990_s21  }
   0x9   : > { %s2703_s23 = scalar_select %p2058_p4, 1, 0 }
   0xa   : > { %s2704_s24 = scalar_select %p2062_p5, 1, 0 }
   0xb   : > { %p1693_p6 = pneg %p2062_p5  ;;  %s78_s29 = sadd.s32 1, %s1986_s20 }
   0xc   : > { %s75_s30 = ssub.s32 %s1990_s21, %s2075_s28  ;;  %s1909_s6 = scalar_lea.vmem %s186_s26, 4096 }
   0xd   : > { %p2070_p7 = pnand %p1693_p6, %p2700_p1  ;;  %p1910_p9 = scmp.ne.s32.totalorder %s186_s26, %s1909_s6 }
   0xe   : > { %p1917_p12 = scmp.lt.s32.totalorder %s186_s26, %s186_s26  ;;  %p1918_p13 = scmp.lt.s32.totalorder %s1909_s6, %s1909_s6 }
   0xf   : > { %p1900_p8 = pneg %p2070_p7 }
  0x10   : > { %p1919_p0 = por %p1918_p13, %p1917_p12 }
  0x11   : > { %p1912_p10 = pnand %p1910_p9, %p1900_p8 }
  0x13   : > { %p1913_p11 = pneg %p1912_p10 }
  0x15   : > { %p1920_p2 = pnand %p1919_p0, %p1913_p11 }
  0x17   : > { %1923 = shalt.err (!%p1920_p2)
}
  0x18   : > { %s1993_s7 = smov 128   ;;  %s1994_s8 = smov 8  }
  0x19   : > { %1696 = dma.hbm_to_vmem [thread:$0]  (!%p2070_p7), %s2698_s4, 4096, %s186_s26, [#allocation5], %s1993_s7, %s1993_s7, %s1994_s8  }
  0x1a   : > { %p76_p3 = scmp.eq.s32.totalorder %s75_s30, 0  ;;  %p85_p6 = scmp.ne.s32.totalorder %s1986_s20, %s1982_s19 }
  0x1b   : > { %p86_p8 = scmp.eq.s32.totalorder %s1990_s21, 0  ;;  %p1702_p9 = scmp.lt.s32.totalorder %s1990_s21, 2 }
  0x1c   : > { %s2095_s11 = scalar_select %p76_p3, %s1986_s20, %s78_s29  }
  0x1d   : > { %p87_p10 = por %p86_p8, %p85_p6  ;;  %s217_s12 = sand.u32 1, %s1986_s20  }
  0x1e   : > { %s1567_s13 = sshll.u32 %s217_s12, 6  ;;  %s1684_s14 = sshll.u32 %s1990_s21, 10 }
  0x1f   : > { %s2102_s17 = scalar_lea.hbm %s2696_s2, %s1684_s14  ;;  %s221_s18 = scalar_lea.vmem [#allocation2], %s1567_s13 }
  0x20   : > { %s228_s25 = sshll.u32 %s221_s18, 4  ;;  %p2106_p7 = pnand %p1702_p9, %p87_p10  ;;  %s2104_s25 = int_to_ptr.vmem [resolvable:$true] %s228_s25 }
  0x21   : > { %s2110_s27 = scalar_lea.sflag [#allocation3], %s217_s12  ;;  %s1924_s21 = scalar_lea.hbm %s2102_s17, 1024 }
  0x22   : > { %p1925_p11 = scmp.ne.s32.totalorder %s2102_s17, %s1924_s21  ;;  %p1926_p12 = pneg %p2106_p7 }
  0x23   : > { %s1929_s6 = scalar_lea.hbm %s2696_s2, 2048  ;;  %p1930_p2 = scmp.lt.s32.totalorder %s2102_s17, %s2696_s2 }
  0x24   : > { %p1927_p13 = pnand %p1926_p12, %p1925_p11  ;;  %p1931_p3 = scmp.lt.s32.totalorder %s1929_s6, %s1924_s21 }
  0x26   : > { %p1928_p0 = pneg %p1927_p13  ;;  %p1932_p6 = por %p1931_p3, %p1930_p2 }
  0x28   : > { %p1933_p8 = pnand %p1932_p6, %p1928_p0 }
  0x2a   : > { %1936 = shalt.err (!%p1933_p8)
}
  0x2b   : > { %s1937_s12 = scalar_lea.vmem %s2104_s25, 1024  ;;  %s1995_s13 = smov [#allocation2]  }
  0x2c   : > { %p1938_p9 = scmp.ne.s32.totalorder %s2104_s25, %s1937_s12  ;;  %s1942_s14 = sshll.u32 %s1995_s13, 4  ;;  %s1943_s14 = int_to_ptr.vmem [resolvable:$false] %s1942_s14 }
  0x2d   : > { %s1944_s15 = scalar_lea.vmem %s1943_s14, 2048  ;;  %p1945_p13 = scmp.lt.s32.totalorder %s2104_s25, %s1943_s14 }
  0x2e   : > { %p1940_p10 = pnand %p1938_p9, %p1926_p12  ;;  %p1946_p1 = scmp.lt.s32.totalorder %s1944_s15, %s1937_s12 }
  0x30   : > { %p1941_p11 = pneg %p1940_p10  ;;  %p1947_p4 = por %p1946_p1, %p1945_p13 }
  0x32   : > { %p1948_p5 = pnand %p1947_p4, %p1941_p11 }
  0x34   : > { %1951 = shalt.err (!%p1948_p5)
}
  0x35   : > { %1700 = dma.hbm_to_vmem [thread:$0]  (!%p2106_p7), %s2102_s17, 1024, %s2104_s25, %s2110_s27, %s1993_s7, %s1993_s7, %s1994_s8  }
  0x36   : > { %p2707_p12 = scmp.ne.s32.totalorder %s2704_s24, 0 }
  0x37   : > { %s242_s16 = sand.u32 (!%p2707_p12), 1, %s1982_s19   ;;  %p2708_p1 = scmp.ne.s32.totalorder (!%p2707_p12), %s2703_s23, 0 }
  0x38   : > { %240 = sbr.rel (%p2707_p12) target bundleno = 911 (0x38f), region = 40  ;;  %s1571_s18 = sshll.u32 (!%p2707_p12), %s242_s16, 6 }
  0x39   : > { %s243_s21 = scalar_lea.sflag (!%p2707_p12), [#allocation3], %s242_s16  ;;  %s2137_s29 = scalar_lea.vmem (!%p2707_p12), [#allocation2], %s1571_s18 }
  0x3d   : > { %1969 = dma.done.wait (%p2708_p1), %s243_s21, 1024  }
  0x3e   : > { %1971 = vsyncadd (%p2708_p1), %s243_s21, 4294966272  ;;  %p2709_p4 = scmp.eq.s32.totalorder %s2050_s22, 0 }
  0x40   : > { %1973 = dma.done.wait (%p2709_p4), [#allocation5], 4096   ;;  %p2710_p5 = pmov %p2709_p4 }
  0x41   : > { %s1573_s24 = sshll.u32 %s2050_s22, 3  ;;  %v1996_v0 = vmov 2   ;;  %v1997_v1 = vmov 1   ;;  %v1770_v4 = vld [vmem:[%s2697_s3 + $0x74] ss:$8 sps:$4 sm:$0xff]   ;;  %v1998_v5 = vmov 3  }
  0x42   : > { %1975 = vsyncadd (%p2710_p5), [#allocation5], 4294963200  ;;  %1745 = vset.pattern.permute.xlu0 %v1996_v0  ;;  %1744 = vset.pattern.permute.xlu1 %v1997_v1  ;;  %p287_p7 = scmp.lt.s32.totalorder %s1573_s24, 15  ;;  %v1772_v6 = vld [vmem:[%s2697_s3 + $0x70] ss:$8 sps:$4 sm:$0xff]   ;;  %v1999_v17 = vmov 0  }
  0x43   : > { %898 = vmatprep.subr.bf16.mxu0 %v1770_v4  ;;  %v1773_v7 = vld [vmem:[%s2697_s3 + $0x64] ss:$8 sps:$4 sm:$0xff]   ;;  %v1775_v9 = vld [vmem:[%s2697_s3 + $0x60] ss:$8 sps:$4 sm:$0xff]   ;;  %v1776_v10 = vld [vmem:[%s2697_s3 + $0x54] ss:$8 sps:$4 sm:$0xff]  }
  0x44   : > { %s2724_s24 = smov (!%p287_p7, %s1573_s24), 15  ;;  %899 = vmatpush1.bf16.msra.mxu0 %v1772_v6  ;;  %v1782_v11 = vld [vmem:[#allocation4 + $0x74] ss:$8 sps:$4 sm:$0xff]   ;;  %v1784_v12 = vld [vmem:[#allocation4 + $0x70] ss:$8 sps:$4 sm:$0xff]   ;;  %p299_p0 = scmp.lt.s32.totalorder %s2050_s22, 1 }
  0x45   : > { %s1574_s23 = sshll.u32 %s2724_s24, 3  ;;  %900 = vmatprep.subr.bf16.mxu0 %v1773_v7  ;;  %v1778_v13 = vld [vmem:[%s2697_s3 + $0x50] ss:$8 sps:$4 sm:$0xff]   ;;  %v1779_v14 = vld [vmem:[%s2697_s3 + $0x44] ss:$8 sps:$4 sm:$0xff]   ;;  %1163 = vmatprep.subr.bf16.mxu1 %v1782_v11 }
  0x46   : > { %s2158_s17 = scalar_lea.vmem %s2694_s0, %s1574_s23  ;;  %1164 = vmatpush1.bf16.msra.mxu1 %v1784_v12  ;;  %v1788_v15 = vld [vmem:[#allocation4 + $0x64] ss:$8 sps:$4 sm:$0xff]   ;;  %v1790_v16 = vld [vmem:[#allocation4 + $0x60] ss:$8 sps:$4 sm:$0xff]   ;;  %s2196_s25 = scalar_lea.vmem %s2695_s1, %s1574_s23  ;;  %v1785_v19 = vld [vmem:[%s2697_s3 + $0x34] ss:$8 sps:$4 sm:$0xff]  }
  0x47   : > { %v303_v2 = vld [vmem:[%s2158_s17] sm:$0xff]  ;;  %v304_v3 = vld [vmem:[%s2158_s17 + $0x8] sm:$0xff]  ;;  %v2173_v8 = vld [vmem:[%s2158_s17 + $0x10] sm:$0xff]  ;;  %1165 = vmatprep.subr.bf16.mxu1 %v1788_v15  ;;  %s2726_s22 = smov (!%p299_p0, %s2050_s22), 1 }
  0x48   : > { %443 = vperm.xlu0 %1745, %v303_v2   ;;  %371 = vperm.xlu1 %1744, %v303_v2   ;;  %v1781_v18 = vld [vmem:[%s2697_s3 + $0x40] ss:$8 sps:$4 sm:$0xff]   ;;  %v1794_v20 = vld [vmem:[#allocation4 + $0x54] ss:$8 sps:$4 sm:$0xff]   ;;  %v1796_v21 = vld [vmem:[#allocation4 + $0x50] ss:$8 sps:$4 sm:$0xff]  }
  0x49   : > { %901 = vmatpush1.bf16.msra.mxu0 %v1775_v9  ;;  %v2205_v22 = vld [vmem:[%s2158_s17 + $0x28] sm:$0xff]  ;;  %v613_v23 = vld [vmem:[%s2196_s25 + $0x18] sm:$0xff]  ;;  %v2228_v34 = vld [vmem:[%s2158_s17 + $0x30] sm:$0xff] }
  0x4a   : > { %902 = vmatprep.subr.bf16.mxu0 %v1776_v10  ;;  %1166 = vmatpush1.bf16.msra.mxu1 %v1790_v16  ;;  %v2210_v24 = vld [vmem:[%s2158_s17 + $0x18] sm:$0xff]  ;;  %v1800_v26 = vld [vmem:[#allocation4 + $0x44] ss:$8 sps:$4 sm:$0xff]   ;;  %v1802_v28 = vld [vmem:[#allocation4 + $0x40] ss:$8 sps:$4 sm:$0xff]   ;;  %v1581_v30 = vadd.s32 4294967279, %v613_v23 }
  0x4b   : > { %1167 = vmatprep.subr.bf16.mxu1 %v1794_v20  ;;  %v1787_v25 = vld [vmem:[%s2697_s3 + $0x30] ss:$8 sps:$4 sm:$0xff]   ;;  %v1791_v27 = vld [vmem:[%s2697_s3 + $0x24] ss:$8 sps:$4 sm:$0xff]   ;;  %v1806_v29 = vld [vmem:[#allocation4 + $0x34] ss:$8 sps:$4 sm:$0xff]  }
  0x4c   : > { %1748 = vset.pattern.permute.xlu0 %v1998_v5  ;;  %374 = vperm.xlu1 %1744, %v304_v3   ;;  %v1793_v31 = vld [vmem:[%s2697_s3 + $0x20] ss:$8 sps:$4 sm:$0xff]   ;;  %v1797_v32 = vld [vmem:[%s2697_s3 + $0x14] ss:$8 sps:$4 sm:$0xff]   ;;  %v1808_v33 = vld [vmem:[#allocation4 + $0x30] ss:$8 sps:$4 sm:$0xff]  }
  0x4d   : > { %518 = vperm.xlu0 %1748, %v304_v3   ;;  %903 = vmatpush1.bf16.msra.mxu0 %v1778_v13  ;;  %v1812_v35 = vld [vmem:[#allocation4 + $0x24] ss:$8 sps:$4 sm:$0xff]   ;;  %v1799_v36 = vld [vmem:[%s2697_s3 + $0x10] ss:$8 sps:$4 sm:$0xff]   ;;  %v1814_v38 = vld [vmem:[#allocation4 + $0x20] ss:$8 sps:$4 sm:$0xff]  }
  0x4e   : > { %904 = vmatprep.subr.bf16.mxu0 %v1779_v14  ;;  %1168 = vmatpush1.bf16.msra.mxu1 %v1796_v21  ;;  %v1803_v37 = vld [vmem:[%s2697_s3 + $0x4] ss:$8 sps:$4 sm:$0xff]   ;;  %v1818_v40 = vld [vmem:[#allocation4 + $0x14] ss:$8 sps:$4 sm:$0xff]   ;;  %v1805_v41 = vld [vmem:[%s2697_s3] ss:$8 sps:$4 sm:$0xff]  }
  0x4f   : > { %1169 = vmatprep.subr.bf16.mxu1 %v1800_v26  ;;  %v610_v39 = vld [vmem:[%s2196_s25] sm:$0xff]  ;;  %v1809_v42 = vld [vmem:[%s2697_s3 + $0xf4] ss:$8 sps:$4 sm:$0xff]   ;;  %v1820_v43 = vld [vmem:[#allocation4 + $0x10] ss:$8 sps:$4 sm:$0xff]  }
  0x50   : > { %1746 = vset.pattern.permute.xlu1 %v1996_v0  ;;  %v1578_v44 = vadd.s32 4294967279, %v610_v39  ;;  %v611_v45 = vld [vmem:[%s2196_s25 + $0x8] sm:$0xff]  ;;  %v1811_v47 = vld [vmem:[%s2697_s3 + $0xf0] ss:$8 sps:$4 sm:$0xff]   ;;  %v1830_v51 = vld [vmem:[#allocation4 + $0xf4] ss:$8 sps:$4 sm:$0xff]  }
  0x51   : > { %521 = vperm.xlu0 %1748, %v2173_v8   ;;  %446 = vperm.xlu1 %1746, %v304_v3   ;;  %v1824_v46 = vld [vmem:[#allocation4 + $0x4] ss:$8 sps:$4 sm:$0xff]   ;;  %v1826_v49 = vld [vmem:[#allocation4] ss:$8 sps:$4 sm:$0xff]   ;;  %v1579_v50 = vadd.s32 4294967279, %v611_v45  ;;  %v612_v21 = vld [vmem:[%s2196_s25 + $0x10] sm:$0xff] }
  0x52   : > { %905 = vmatpush1.bf16.msra.mxu0 %v1781_v18  ;;  %1170 = vmatpush1.bf16.msra.mxu1 %v1802_v28  ;;  %v1815_v48 = vld [vmem:[%s2697_s3 + $0xe4] ss:$8 sps:$4 sm:$0xff]   ;;  %v1817_v52 = vld [vmem:[%s2697_s3 + $0xe0] ss:$8 sps:$4 sm:$0xff]   ;;  %v1821_v53 = vld [vmem:[%s2697_s3 + $0xd4] ss:$8 sps:$4 sm:$0xff]  }
  0x53   : > { %906 = vmatprep.subr.bf16.mxu0 %v1785_v19  ;;  %1171 = vmatprep.subr.bf16.mxu1 %v1806_v29  ;;  %v1832_v54 = vld [vmem:[#allocation4 + $0xf0] ss:$8 sps:$4 sm:$0xff]   ;;  %v1836_v55 = vld [vmem:[#allocation4 + $0xe4] ss:$8 sps:$4 sm:$0xff]   ;;  %v1838_v58 = vld [vmem:[#allocation4 + $0xe0] ss:$8 sps:$4 sm:$0xff]  }
  0x54   : > { %v1823_v56 = vld [vmem:[%s2697_s3 + $0xd0] ss:$8 sps:$4 sm:$0xff]   ;;  %v1827_v57 = vld [vmem:[%s2697_s3 + $0xc4] ss:$8 sps:$4 sm:$0xff]   ;;  %v1842_v59 = vld [vmem:[#allocation4 + $0xd4] ss:$8 sps:$4 sm:$0xff]  }
  0x55   : > { %1753 = vset.pattern.permute.xlu0 %v1999_v17  ;;  %1747 = vset.pattern.permute.xlu1 %v1998_v5  ;;  %v2276_v60 = vld [vmem:[%s2158_s17 + $0x20] sm:$0xff]  ;;  %v1833_v62 = vld [vmem:[%s2697_s3 + $0xb4] ss:$8 sps:$4 sm:$0xff]   ;;  %v1844_v63 = vld [vmem:[#allocation4 + $0xd0] ss:$8 sps:$4 sm:$0xff]  }
  0x56   : > { %315 = vperm.xlu0 %1753, %v303_v2   ;;  %515 = vperm.xlu1 %1747, %v303_v2   ;;  %v1829_v61 = vld [vmem:[%s2697_s3 + $0xc0] ss:$8 sps:$4 sm:$0xff]   ;;  %v1848_v2 = vld [vmem:[#allocation4 + $0xc4] ss:$8 sps:$4 sm:$0xff]   ;;  %v1835_v4 = vld [vmem:[%s2697_s3 + $0xb0] ss:$8 sps:$4 sm:$0xff]  }
  0x57   : > { %907 = vmatpush1.bf16.msra.mxu0 %v1787_v25  ;;  %1172 = vmatpush1.bf16.msra.mxu1 %v1808_v33  ;;  %v1839_v6 = vld [vmem:[%s2697_s3 + $0xa4] ss:$8 sps:$4 sm:$0xff]   ;;  %v1850_v7 = vld [vmem:[#allocation4 + $0xc0] ss:$8 sps:$4 sm:$0xff]   ;;  %v1854_v10 = vld [vmem:[#allocation4 + $0xb4] ss:$8 sps:$4 sm:$0xff]  }
  0x58   : > { %908 = vmatprep.subr.bf16.mxu0 %v1791_v27  ;;  %1173 = vmatprep.subr.bf16.mxu1 %v1812_v35  ;;  %v1841_v9 = vld [vmem:[%s2697_s3 + $0xa0] ss:$8 sps:$4 sm:$0xff]   ;;  %v1845_v11 = vld [vmem:[%s2697_s3 + $0x94] ss:$8 sps:$4 sm:$0xff]   ;;  %v1856_v13 = vld [vmem:[#allocation4 + $0xb0] ss:$8 sps:$4 sm:$0xff]  }
  0x59   : > { %v1847_v14 = vld [vmem:[%s2697_s3 + $0x90] ss:$8 sps:$4 sm:$0xff]   ;;  %v1857_v15 = vld [vmem:[#allocation4 + $0xa4] ss:$8 sps:$4 sm:$0xff]   ;;  %v1859_v18 = vld [vmem:[#allocation4 + $0xa0] ss:$8 sps:$4 sm:$0xff]  }
  0x5a   : > { %318 = vperm.xlu0 %1753, %v304_v3   ;;  %1749 = vset.pattern.permute.xlu1 %v1999_v17  ;;  %v2287_v3 = vld [vmem:[%s2158_s17 + $0x38] sm:$0xff]  ;;  %v1851_v16 = vld [vmem:[%s2697_s3 + $0x84] ss:$8 sps:$4 sm:$0xff]   ;;  %v1853_v19 = vld [vmem:[%s2697_s3 + $0x80] ss:$8 sps:$4 sm:$0xff]  }
  0x5b   : > { %321 = vperm.xlu1 %1749, %v2173_v8   ;;  %909 = vmatpush1.bf16.msra.mxu0 %v1793_v31  ;;  %v1860_v20 = vld [vmem:[#allocation4 + $0x94] ss:$8 sps:$4 sm:$0xff]   ;;  %v1862_v23 = vld [vmem:[#allocation4 + $0x90] ss:$8 sps:$4 sm:$0xff]   ;;  %v1863_v25 = vld [vmem:[#allocation4 + $0x84] ss:$8 sps:$4 sm:$0xff]  }
  0x5c   : > { %910 = vmatprep.subr.bf16.mxu0 %v1797_v32  ;;  %1174 = vmatpush1.bf16.msra.mxu1 %v1814_v38  ;;  %v1865_v26 = vld [vmem:[#allocation4 + $0x80] ss:$8 sps:$4 sm:$0xff]   ;;  %v311_v32 = vlaneseq }
  0x5d   : > { %1175 = vmatprep.subr.bf16.mxu1 %v1818_v40  ;;  %v614_v27 = vld [vmem:[%s2196_s25 + $0x20] sm:$0xff]  ;;  %v615_v29 = vld [vmem:[%s2196_s25 + $0x28] sm:$0xff] }
  0x5e   : > { %330 = vperm.xlu0 %1753, %v2205_v22   ;;  %v1582_v28 = vadd.s32 4294967279, %v614_v27  ;;  %v2339_v35 = vand.u32 127, %v311_v32 }
  0x5f   : > { %324 = vperm.xlu1 %1749, %v2210_v24   ;;  %911 = vmatpush1.bf16.msra.mxu0 %v1799_v36 }
  0x60   : > { %912 = vmatprep.subr.bf16.mxu0 %v1803_v37  ;;  %1176 = vmatpush1.bf16.msra.mxu1 %v1820_v43  ;;  %v2344_v38 = vadd.s32 128, %v2339_v35 }
  0x61   : > { %1177 = vmatprep.subr.bf16.mxu1 %v1824_v46 }
  0x62   : > { %636 = vperm.xlu0 %1753, %v1581_v30   ;;  %v1583_v30 = vadd.s32 4294967279, %v615_v29 }
  0x63   : > { %1750 = vset.pattern.permute.xlu1 %v1997_v1  ;;  %913 = vmatpush1.bf16.msra.mxu0 %v1805_v41 }
  0x64   : > { %380 = vperm.xlu1 %1750, %v2210_v24   ;;  %914 = vmatprep.subr.bf16.mxu0 %v1809_v42 }
  0x65   : > { %1178 = vmatpush1.bf16.msra.mxu1 %v1826_v49 }
  0x66   : > { %333 = vperm.xlu0 %1753, %v2228_v34   ;;  %1179 = vmatprep.subr.bf16.mxu1 %v1830_v51 }
  0x67   : > { %915 = vmatpush2.bf16.msra.mxu0 %v1811_v47 }
  0x68   : > { %1751 = vset.pattern.permute.xlu1 %v1996_v0  ;;  %916 = vmatprep.subr.bf16.mxu0 %v1815_v48 }
  0x69   : > { %449 = vperm.xlu1 %1751, %v2173_v8   ;;  %1180 = vmatpush2.bf16.msra.mxu1 %v1832_v54 }
  0x6a   : > { %1760 = vset.pattern.permute.xlu0 %v1997_v1  ;;  %1181 = vmatprep.subr.bf16.mxu1 %v1836_v55 }
  0x6b   : > { %377 = vperm.xlu0 %1760, %v2173_v8   ;;  %917 = vmatpush2.bf16.msra.mxu0 %v1817_v52  ;;  %v617_v8 = vld [vmem:[%s2196_s25 + $0x38] sm:$0xff] }
  0x6c   : > { %918 = vmatprep.subr.bf16.mxu0 %v1821_v53  ;;  %v1585_v12 = vadd.s32 4294967279, %v617_v8 }
  0x6d   : > { %1752 = vset.pattern.permute.xlu1 %v1999_v17  ;;  %1182 = vmatpush2.bf16.msra.mxu1 %v1838_v58 }
  0x6e   : > { %627 = vperm.xlu1 %1752, %v1578_v44   ;;  %1183 = vmatprep.subr.bf16.mxu1 %v1842_v59 }
  0x6f   : > { %389 = vperm.xlu0 %1760, %v2228_v34   ;;  %919 = vmatpush2.bf16.msra.mxu0 %v1823_v56 }
  0x70   : > { %920 = vmatprep.subr.bf16.mxu0 %v1827_v57 }
  0x71   : > { %1184 = vmatpush2.bf16.msra.mxu1 %v1844_v63 }
  0x72   : > { %630 = vperm.xlu1 %1752, %v1579_v50   ;;  %1185 = vmatprep.subr.bf16.mxu1 %v1848_v2 }
  0x73   : > { %1762 = vset.pattern.permute.xlu0 %v1996_v0  ;;  %921 = vmatpush2.bf16.msra.mxu0 %v1829_v61 }
  0x74   : > { %452 = vperm.xlu0 %1762, %v2210_v24   ;;  %922 = vmatprep.subr.bf16.mxu0 %v1833_v62 }
  0x75   : > { %1186 = vmatpush2.bf16.msra.mxu1 %v1850_v7 }
  0x76   : > { %1754 = vset.pattern.permute.xlu1 %v1998_v5  ;;  %1187 = vmatprep.subr.bf16.mxu1 %v1854_v10 }
  0x77   : > { %524 = vperm.xlu1 %1754, %v2210_v24   ;;  %923 = vmatpush2.bf16.msra.mxu0 %v1835_v4  ;;  %v1580_v24 = vadd.s32 4294967279, %v612_v21 }
  0x78   : > { %455 = vperm.xlu0 %1762, %v2276_v60   ;;  %924 = vmatprep.subr.bf16.mxu0 %v1839_v6 }
  0x79   : > { %1188 = vmatpush2.bf16.msra.mxu1 %v1856_v13 }
  0x7a   : > { %1189 = vmatprep.subr.bf16.mxu1 %v1857_v15 }
  0x7b   : > { %1755 = vset.pattern.permute.xlu1 %v1999_v17  ;;  %925 = vmatpush2.bf16.msra.mxu0 %v1841_v9 }
  0x7c   : > { %327 = vperm.xlu1 %1755, %v2276_v60   ;;  %464 = vperm.xlu0 %1762, %v2287_v3  }
  0x7d   : > { %926 = vmatprep.subr.bf16.mxu0 %v1845_v11  ;;  %1190 = vmatpush2.bf16.msra.mxu1 %v1859_v18 }
  0x7e   : > { %1191 = vmatprep.subr.bf16.mxu1 %v1860_v20 }
  0x7f   : > { %927 = vmatpush2.bf16.msra.mxu0 %v1847_v14 }
  0x80   : > { %1756 = vset.pattern.permute.xlu1 %v1997_v1  ;;  %1766 = vset.pattern.permute.xlu0 %v1998_v5 }
  0x81   : > { %383 = vperm.xlu1 %1756, %v2276_v60   ;;  %533 = vperm.xlu0 %1766, %v2228_v34  }
  0x82   : > { %928 = vmatprep.subr.bf16.mxu0 %v1851_v16  ;;  %1192 = vmatpush2.bf16.msra.mxu1 %v1862_v23 }
  0x83   : > { %929 = vmatpush2.bf16.msra.mxu0 %v1853_v19  ;;  %1193 = vmatprep.subr.bf16.mxu1 %v1863_v25 }
  0x85   : > { %386 = vperm.xlu1 %1756, %v2205_v22   ;;  %1769 = vset.pattern.permute.xlu0 %v1999_v17 }
  0x86   : > { %648 = vperm.xlu0 %1769, %v1585_v12   ;;  %1194 = vmatpush2.bf16.msra.mxu1 %v1865_v26 }
  0x89   : > { %1757 = vset.pattern.permute.xlu1 %v1996_v0 }
  0x8a   : > { %458 = vperm.xlu1 %1757, %v2205_v22  }
  0x8e   : > { %1758 = vset.pattern.permute.xlu1 %v1999_v17 }
  0x8f   : > { %633 = vperm.xlu1 %1758, %v1580_v24  }
  0x93   : > { %1759 = vset.pattern.permute.xlu1 %v1998_v5 }
  0x94   : > { %527 = vperm.xlu1 %1759, %v2276_v60  }
  0x98   : > { %530 = vperm.xlu1 %1759, %v2205_v22   ;;  %v616_v22 = vld [vmem:[%s2196_s25 + $0x30] sm:$0xff] }
  0x9c   : > { %1761 = vset.pattern.permute.xlu1 %v1999_v17 }
  0x9d   : > { %336 = vperm.xlu1 %1761, %v2287_v3  }
  0xa1   : > { %1763 = vset.pattern.permute.xlu1 %v1997_v1  ;;  %v1584_v1 = vadd.s32 4294967279, %v616_v22 }
  0xa2   : > { %392 = vperm.xlu1 %1763, %v2287_v3  }
  0xa6   : > { %1764 = vset.pattern.permute.xlu1 %v1996_v0 }
  0xa7   : > { %461 = vperm.xlu1 %1764, %v2228_v34  }
  0xab   : > { %1765 = vset.pattern.permute.xlu1 %v1999_v17 }
  0xac   : > { %639 = vperm.xlu1 %1765, %v1582_v28  }
  0xb0   : > { %642 = vperm.xlu1 %1765, %v1583_v30  }
  0xb4   : > { %1767 = vset.pattern.permute.xlu1 %v1998_v5 }
  0xb5   : > { %536 = vperm.xlu1 %1767, %v2287_v3  }
  0xb9   : > { %1768 = vset.pattern.permute.xlu1 %v1999_v17 }
  0xba   : > { %645 = vperm.xlu1 %1768, %v1584_v1  }
  0xc3   : > { %v372_v31 = vpop.permute.xlu1 %371  ;;  %v444_v0 = vpop.permute.xlu0 %443 }
  0xc4   : > { %vm394_vm0 = vcmp.eq.s32.totalorder %v372_v31, %v2339_v35  ;;  %vm395_vm1 = vcmp.eq.s32.totalorder %v372_v31, %v2344_v38  ;;  %vm466_vm2 = vcmp.eq.s32.totalorder %v444_v0, %v2339_v35  ;;  %vm467_vm3 = vcmp.eq.s32.totalorder %v444_v0, %v2344_v38 }
  0xc5   : > { %v410_v40 = vsel %vm394_vm0, 1, %v1999_v17  ;;  %v411_v43 = vsel %vm395_vm1, 1, %v1999_v17  ;;  %v482_v44 = vsel %vm466_vm2, 1, %v1999_v17  ;;  %v483_v46 = vsel %vm467_vm3, 1, %v1999_v17 }
  0xc7   : > { %v375_v33 = vpop.permute.xlu1 %374 }
  0xc8   : > { %v519_v34 = vpop.permute.xlu0 %518  ;;  %vm396_vm4 = vcmp.eq.s32.totalorder %v375_v33, %v2339_v35  ;;  %vm397_vm5 = vcmp.eq.s32.totalorder %v375_v33, %v2344_v38 }
  0xc9   : > { %v412_v47 = vsel %vm396_vm4, 1, %v1999_v17  ;;  %v413_v48 = vsel %vm397_vm5, 1, %v1999_v17  ;;  %vm540_vm8 = vcmp.eq.s32.totalorder %v519_v34, %v2339_v35  ;;  %vm541_vm12 = vcmp.eq.s32.totalorder %v519_v34, %v2344_v38 }
  0xca   : > { %v556_v60 = vsel %vm540_vm8, 1, %v1999_v17  ;;  %v557_v63 = vsel %vm541_vm12, 1, %v1999_v17 }
  0xcc   : > { %v447_v36 = vpop.permute.xlu1 %446  ;;  %v2341_v37 = vpop.permute.xlu0 %521 }
  0xcd   : > { %vm468_vm9 = vcmp.eq.s32.totalorder %v447_v36, %v2339_v35  ;;  %vm469_vm13 = vcmp.eq.s32.totalorder %v447_v36, %v2344_v38  ;;  %vm542_vm0 = vcmp.eq.s32.totalorder %v2341_v37, %v2339_v35  ;;  %vm543_vm1 = vcmp.eq.s32.totalorder %v2341_v37, %v2344_v38 }
  0xce   : > { %v484_v57 = vsel %vm468_vm9, 1, %v1999_v17  ;;  %v485_v2 = vsel %vm469_vm13, 1, %v1999_v17  ;;  %v558_v23 = vsel %vm542_vm0, 1, %v1999_v17  ;;  %v559_v24 = vsel %vm543_vm1, 1, %v1999_v17 }
  0xd1   : > { %v316_v5 = vpop.permute.xlu0 %315  ;;  %v516_v39 = vpop.permute.xlu1 %515 }
  0xd2   : > { %vm338_vm6 = vcmp.eq.s32.totalorder %v316_v5, %v2339_v35  ;;  %vm339_vm7 = vcmp.eq.s32.totalorder %v316_v5, %v2344_v38  ;;  %vm538_vm14 = vcmp.eq.s32.totalorder %v516_v39, %v2339_v35  ;;  %vm539_vm15 = vcmp.eq.s32.totalorder %v516_v39, %v2344_v38 }
  0xd3   : > { %v354_v41 = vsel %vm338_vm6, 1, %v1999_v17  ;;  %v355_v42 = vsel %vm339_vm7, 1, %v1999_v17  ;;  %v554_v3 = vsel %vm538_vm14, 1, %v1999_v17  ;;  %v555_v4 = vsel %vm539_vm15, 1, %v1999_v17 }
  0xd4   : > { %v426_v45 = vadd.s32 %v410_v40, %v354_v41  ;;  %v427_v49 = vadd.s32 %v411_v43, %v355_v42 }
  0xd5   : > { %v319_v50 = vpop.permute.xlu0 %318 }
  0xd6   : > { %vm340_vm10 = vcmp.eq.s32.totalorder %v319_v50, %v2339_v35  ;;  %vm341_vm11 = vcmp.eq.s32.totalorder %v319_v50, %v2344_v38  ;;  %v322_v51 = vpop.permute.xlu1 %321  ;;  %v498_v54 = vadd.s32 %v482_v44, %v426_v45  ;;  %v499_v59 = vadd.s32 %v483_v46, %v427_v49 }
  0xd7   : > { %v356_v52 = vsel %vm340_vm10, 1, %v1999_v17  ;;  %v357_v53 = vsel %vm341_vm11, 1, %v1999_v17  ;;  %vm342_vm2 = vcmp.eq.s32.totalorder %v322_v51, %v2339_v35  ;;  %vm343_vm3 = vcmp.eq.s32.totalorder %v322_v51, %v2344_v38 }
  0xd8   : > { %v428_v55 = vadd.s32 %v412_v47, %v356_v52  ;;  %v429_v56 = vadd.s32 %v413_v48, %v357_v53  ;;  %v570_v6 = vadd.s32 %v554_v3, %v498_v54  ;;  %v571_v9 = vadd.s32 %v555_v4, %v499_v59 }
  0xd9   : > { %v2373_v58 = vpop.permute.xlu0 %330  ;;  %v358_v26 = vsel %vm342_vm2, 1, %v1999_v17  ;;  %v359_v27 = vsel %vm343_vm3, 1, %v1999_v17  ;;  %v2000_v52 = vmov 1.0|1.0  }
  0xda   : > { %v500_v61 = vadd.s32 %v484_v57, %v428_v55  ;;  %v2378_v62 = vpop.permute.xlu1 %324  ;;  %v501_v7 = vadd.s32 %v485_v2, %v429_v56  ;;  %v586_v14 = vcvt.s32.f32 %v570_v6  ;;  %v587_v18 = vcvt.s32.f32 %v571_v9 }
  0xdb   : > { %vm344_vm8 = vcmp.eq.s32.totalorder %v2378_v62, %v2339_v35  ;;  %vm345_vm9 = vcmp.eq.s32.totalorder %v2378_v62, %v2344_v38 }
  0xdc   : > { %v572_v10 = vadd.s32 %v556_v60, %v500_v61  ;;  %v573_v11 = vadd.s32 %v557_v63, %v501_v7  ;;  %v360_v33 = vsel %vm344_vm8, 1, %v1999_v17  ;;  %v361_v44 = vsel %vm345_vm9, 1, %v1999_v17 }
  0xdd   : > { %v2384_v8 = vpop.permute.xlu0 %636 }
  0xde   : > { %v588_v13 = vcvt.s32.f32 %v572_v10  ;;  %v589_v15 = vcvt.s32.f32 %v573_v11 }
  0xdf   : > { %v381_v12 = vpop.permute.xlu1 %380 }
  0xe0   : > { %v602_v19 = vpack.c.bf16 %v588_v13, %v586_v14  ;;  %v603_v20 = vpack.c.bf16 %v589_v15, %v587_v18  ;;  %vm400_vm10 = vcmp.eq.s32.totalorder %v381_v12, %v2339_v35  ;;  %vm401_vm11 = vcmp.eq.s32.totalorder %v381_v12, %v2344_v38 }
  0xe1   : > { %v334_v16 = vpop.permute.xlu0 %333  ;;  %v416_v34 = vsel %vm400_vm10, 1, %v1999_v17  ;;  %v417_v5 = vsel %vm401_vm11, 1, %v1999_v17  ;;  %vm348_vm10 = vcmp.eq.s32.totalorder %v2373_v58, %v2339_v35 }
  0xe2   : > { %930 = vmatprep.mubr.bf16.mxu0 %v603_v20  ;;  %vm350_vm4 = vcmp.eq.s32.totalorder %v334_v16, %v2339_v35  ;;  %vm351_vm5 = vcmp.eq.s32.totalorder %v334_v16, %v2344_v38  ;;  %v432_v48 = vadd.s32 %v416_v34, %v360_v33  ;;  %v433_v49 = vadd.s32 %v417_v5, %v361_v44 }
  0xe3   : > { %931 = vmatmul.mubr.bf16.vlgmr.msra.gmra.mxu0 %v602_v19  ;;  %v366_v22 = vsel %vm350_vm4, 1, %v1999_v17  ;;  %v367_v1 = vsel %vm351_vm5, 1, %v1999_v17  ;;  %v364_v13 = vsel %vm348_vm10, 1, %v1999_v17 }
  0xe4   : > { %v450_v21 = vpop.permute.xlu1 %449 }
  0xe5   : > { %vm470_vm12 = vcmp.eq.s32.totalorder %v450_v21, %v2339_v35  ;;  %vm471_vm13 = vcmp.eq.s32.totalorder %v450_v21, %v2344_v38 }
  0xe6   : > { %v378_v25 = vpop.permute.xlu0 %377  ;;  %v486_v39 = vsel %vm470_vm12, 1, %v1999_v17  ;;  %v487_v43 = vsel %vm471_vm13, 1, %v1999_v17  ;;  %vm349_vm13 = vcmp.eq.s32.totalorder %v2373_v58, %v2344_v38 }
  0xe7   : > { %vm398_vm6 = vcmp.eq.s32.totalorder %v378_v25, %v2339_v35  ;;  %vm399_vm7 = vcmp.eq.s32.totalorder %v378_v25, %v2344_v38  ;;  %v365_v58 = vsel %vm349_vm13, 1, %v1999_v17 }
  0xe8   : > { %v414_v28 = vsel %vm398_vm6, 1, %v1999_v17  ;;  %v415_v29 = vsel %vm399_vm7, 1, %v1999_v17 }
  0xe9   : > { %v628_v30 = vpop.permute.xlu1 %627  ;;  %v430_v0 = vadd.s32 %v414_v28, %v358_v26  ;;  %v431_v32 = vadd.s32 %v415_v29, %v359_v27 }
  0xea   : > { %v390_v31 = vpop.permute.xlu0 %389  ;;  %vm650_vm0 = vcmp.eq.s32.totalorder %v628_v30, %v2339_v35  ;;  %vm651_vm4 = vcmp.eq.s32.totalorder %v628_v30, %v2344_v38 }
  0xeb   : > { %vm406_vm14 = vcmp.eq.s32.totalorder %v390_v31, %v2339_v35  ;;  %vm407_vm15 = vcmp.eq.s32.totalorder %v390_v31, %v2344_v38  ;;  %v502_v45 = vadd.s32 %v486_v39, %v430_v0  ;;  %v503_v46 = vadd.s32 %v487_v43, %v431_v32 }
  0xec   : > { %v422_v36 = vsel %vm406_vm14, 1, %v1999_v17  ;;  %v423_v37 = vsel %vm407_vm15, 1, %v1999_v17  ;;  %vm657_vm14 = vcmp.eq.s32.totalorder %v2384_v8, %v2344_v38 }
  0xed   : > { %v2420_v40 = vadd.s32 %v422_v36, %v366_v22  ;;  %v2422_v41 = vadd.s32 %v423_v37, %v367_v1  ;;  %v631_v42 = vpop.permute.xlu1 %630  ;;  %v575_v56 = vadd.s32 %v559_v24, %v503_v46  ;;  %v574_v57 = vadd.s32 %v558_v23, %v502_v45 }
  0xee   : > { %vm652_vm1 = vcmp.eq.s32.totalorder %v631_v42, %v2339_v35  ;;  %vm653_vm2 = vcmp.eq.s32.totalorder %v631_v42, %v2344_v38 }
  0xef   : > { %vm1668_vm3 = vmpackc.low %vm652_vm1, %vm650_vm0  ;;  %v453_v47 = vpop.permute.xlu0 %452  ;;  %v591_v4 = vcvt.s32.f32 %v575_v56  ;;  %v590_v6 = vcvt.s32.f32 %v574_v57 }
  0xf0   : > { %vm472_vm5 = vcmp.eq.s32.totalorder %v453_v47, %v2339_v35  ;;  %vm473_vm6 = vcmp.eq.s32.totalorder %v453_v47, %v2344_v38  ;;  %vm1666_vm7 = vmpackc.low %vm653_vm2, %vm651_vm4 }
  0xf1   : > { %v488_v50 = vsel %vm472_vm5, 1, %v1999_v17  ;;  %v489_v51 = vsel %vm473_vm6, 1, %v1999_v17  ;;  %1667 = vmatprep.mubr.msk.bf16.mxu1 %vm1666_vm7, %v2000_v52  ;;  %vm656_vm5 = vcmp.eq.s32.totalorder %v2384_v8, %v2339_v35 }
  0xf2   : > { %v504_v53 = vadd.s32 %v488_v50, %v432_v48  ;;  %v505_v54 = vadd.s32 %v489_v51, %v433_v49  ;;  %1669 = vmatmul.mubr.msk.bf16.vlgmr.msra.gmra.mxu1 %vm1668_vm3, %v2000_v52  ;;  %v525_v55 = vpop.permute.xlu1 %524 }
  0xf3   : > { %vm544_vm8 = vcmp.eq.s32.totalorder %v525_v55, %v2339_v35  ;;  %vm545_vm9 = vcmp.eq.s32.totalorder %v525_v55, %v2344_v38  ;;  %v456_v14 = vpop.permute.xlu0 %455 }
  0xf4   : > { %v560_v59 = vsel %vm544_vm8, 1, %v1999_v17  ;;  %v561_v60 = vsel %vm545_vm9, 1, %v1999_v17  ;;  %vm474_vm6 = vcmp.eq.s32.totalorder %v456_v14, %v2339_v35  ;;  %vm475_vm7 = vcmp.eq.s32.totalorder %v456_v14, %v2344_v38 }
  0xf5   : > { %v576_v61 = vadd.s32 %v560_v59, %v504_v53  ;;  %v577_v62 = vadd.s32 %v561_v60, %v505_v54  ;;  %v490_v25 = vsel %vm474_vm6, 1, %v1999_v17  ;;  %v491_v26 = vsel %vm475_vm7, 1, %v1999_v17 }
  0xf7   : > { %v592_v63 = vcvt.s32.f32 %v576_v61  ;;  %v593_v2 = vcvt.s32.f32 %v577_v62  ;;  %v328_v3 = vpop.permute.xlu1 %327  ;;  %v465_v55 = vpop.permute.xlu0 %464 }
  0xf8   : > { %vm346_vm15 = vcmp.eq.s32.totalorder %v328_v3, %v2339_v35  ;;  %vm347_vm0 = vcmp.eq.s32.totalorder %v328_v3, %v2344_v38  ;;  %vm481_vm7 = vcmp.eq.s32.totalorder %v465_v55, %v2344_v38 }
  0xf9   : > { %v605_v7 = vpack.c.bf16 %v593_v2, %v591_v4  ;;  %v604_v9 = vpack.c.bf16 %v592_v63, %v590_v6  ;;  %v362_v19 = vsel %vm346_vm15, 1, %v1999_v17  ;;  %v363_v20 = vsel %vm347_vm0, 1, %v1999_v17 }
  0xfb   : > { %940 = vmatprep.mubr.bf16.mxu0 %v605_v7 }
  0xfc   : > { %941 = vmatmul.mubr.bf16.gmra.mxu0 %v604_v9  ;;  %v384_v10 = vpop.permute.xlu1 %383  ;;  %v534_v59 = vpop.permute.xlu0 %533  ;;  %v497_v9 = vsel %vm481_vm7, 1, %v1999_v17 }
  0xfd   : > { %vm402_vm11 = vcmp.eq.s32.totalorder %v384_v10, %v2339_v35  ;;  %vm403_vm12 = vcmp.eq.s32.totalorder %v384_v10, %v2344_v38 }
  0xfe   : > { %v418_v15 = vsel %vm402_vm11, 1, %v1999_v17  ;;  %v419_v16 = vsel %vm403_vm12, 1, %v1999_v17 }
  0xff   : > { %v434_v21 = vadd.s32 %v418_v15, %v362_v19  ;;  %v435_v23 = vadd.s32 %v419_v16, %v363_v20 }
 0x100   : > { %v387_v11 = vpop.permute.xlu1 %386 }
 0x101   : > { %vm404_vm1 = vcmp.eq.s32.totalorder %v387_v11, %v2339_v35  ;;  %vm405_vm2 = vcmp.eq.s32.totalorder %v387_v11, %v2344_v38  ;;  %v506_v0 = vadd.s32 %v490_v25, %v434_v21  ;;  %v507_v32 = vadd.s32 %v491_v26, %v435_v23 }
 0x102   : > { %v420_v24 = vsel %vm404_vm1, 1, %v1999_v17  ;;  %v421_v8 = vsel %vm405_vm2, 1, %v1999_v17 }
 0x103   : > { %v436_v30 = vadd.s32 %v420_v24, %v364_v13  ;;  %v437_v22 = vadd.s32 %v421_v8, %v365_v58 }
 0x105   : > { %v459_v12 = vpop.permute.xlu1 %458 }
 0x106   : > { %vm476_vm9 = vcmp.eq.s32.totalorder %v459_v12, %v2339_v35  ;;  %vm477_vm10 = vcmp.eq.s32.totalorder %v459_v12, %v2344_v38 }
 0x107   : > { %v492_v28 = vsel %vm476_vm9, 1, %v1999_v17  ;;  %v493_v29 = vsel %vm477_vm10, 1, %v1999_v17  ;;  %vm551_vm9 = vcmp.eq.s32.totalorder %v534_v59, %v2344_v38 }
 0x108   : > { %v508_v33 = vadd.s32 %v492_v28, %v436_v30  ;;  %v509_v34 = vadd.s32 %v493_v29, %v437_v22  ;;  %v567_v13 = vsel %vm551_vm9, 1, %v1999_v17 }
 0x10a   : > { %v634_v18 = vpop.permute.xlu1 %633 }
 0x10b   : > { %vm654_vm3 = vcmp.eq.s32.totalorder %v634_v18, %v2339_v35  ;;  %vm655_vm4 = vcmp.eq.s32.totalorder %v634_v18, %v2344_v38 }
 0x10c   : > { %vm1670_vm8 = vmpackc.low %vm657_vm14, %vm655_vm4 }
 0x10d   : > { %vm1672_vm11 = vmpackc.low %vm656_vm5, %vm654_vm3  ;;  %1671 = vmatprep.mubr.msk.bf16.mxu1 %vm1670_vm8, %v2000_v52  ;;  %vm480_vm3 = vcmp.eq.s32.totalorder %v465_v55, %v2339_v35  ;;  %vm550_vm8 = vcmp.eq.s32.totalorder %v534_v59, %v2339_v35 }
 0x10e   : > { %1673 = vmatmul.mubr.msk.bf16.gmra.mxu1 %vm1672_vm11, %v2000_v52  ;;  %v496_v62 = vsel %vm480_vm3, 1, %v1999_v17  ;;  %v566_v12 = vsel %vm550_vm8, 1, %v1999_v17 }
 0x10f   : > { %v528_v27 = vpop.permute.xlu1 %527 }
 0x110   : > { %vm546_vm12 = vcmp.eq.s32.totalorder %v528_v27, %v2339_v35  ;;  %vm547_vm13 = vcmp.eq.s32.totalorder %v528_v27, %v2344_v38 }
 0x111   : > { %v562_v1 = vsel %vm546_vm12, 1, %v1999_v17  ;;  %v563_v31 = vsel %vm547_vm13, 1, %v1999_v17 }
 0x112   : > { %v578_v37 = vadd.s32 %v562_v1, %v506_v0  ;;  %v579_v5 = vadd.s32 %v563_v31, %v507_v32 }
 0x113   : > { %v531_v36 = vpop.permute.xlu1 %530 }
 0x114   : > { %vm548_vm14 = vcmp.eq.s32.totalorder %v531_v36, %v2339_v35  ;;  %vm549_vm15 = vcmp.eq.s32.totalorder %v531_v36, %v2344_v38  ;;  %v594_v45 = vcvt.s32.f32 %v578_v37  ;;  %v595_v46 = vcvt.s32.f32 %v579_v5 }
 0x115   : > { %v564_v39 = vsel %vm548_vm14, 1, %v1999_v17  ;;  %v565_v42 = vsel %vm549_vm15, 1, %v1999_v17 }
 0x116   : > { %v580_v43 = vadd.s32 %v564_v39, %v508_v33  ;;  %v581_v44 = vadd.s32 %v565_v42, %v509_v34 }
 0x118   : > { %v596_v47 = vcvt.s32.f32 %v580_v43  ;;  %v597_v48 = vcvt.s32.f32 %v581_v44  ;;  %v337_v49 = vpop.permute.xlu1 %336 }
 0x119   : > { %vm352_vm2 = vcmp.eq.s32.totalorder %v337_v49, %v2339_v35  ;;  %vm353_vm6 = vcmp.eq.s32.totalorder %v337_v49, %v2344_v38 }
 0x11a   : > { %v607_v50 = vpack.c.bf16 %v597_v48, %v595_v46  ;;  %v606_v51 = vpack.c.bf16 %v596_v47, %v594_v45  ;;  %v368_v61 = vsel %vm352_vm2, 1, %v1999_v17  ;;  %v369_v3 = vsel %vm353_vm6, 1, %v1999_v17 }
 0x11c   : > { %950 = vmatprep.mubr.bf16.mxu0 %v607_v50 }
 0x11d   : > { %951 = vmatmul.mubr.bf16.gmra.mxu0 %v606_v51  ;;  %v393_v53 = vpop.permute.xlu1 %392 }
 0x11e   : > { %vm408_vm0 = vcmp.eq.s32.totalorder %v393_v53, %v2339_v35  ;;  %vm409_vm1 = vcmp.eq.s32.totalorder %v393_v53, %v2344_v38 }
 0x11f   : > { %v424_v57 = vsel %vm408_vm0, 1, %v1999_v17  ;;  %v425_v60 = vsel %vm409_vm1, 1, %v1999_v17 }
 0x120   : > { %v440_v4 = vadd.s32 %v424_v57, %v368_v61  ;;  %v441_v7 = vadd.s32 %v425_v60, %v369_v3 }
 0x122   : > { %v462_v54 = vpop.permute.xlu1 %461  ;;  %v512_v14 = vadd.s32 %v496_v62, %v440_v4  ;;  %v513_v15 = vadd.s32 %v497_v9, %v441_v7 }
 0x123   : > { %vm478_vm4 = vcmp.eq.s32.totalorder %v462_v54, %v2339_v35  ;;  %vm479_vm5 = vcmp.eq.s32.totalorder %v462_v54, %v2344_v38 }
 0x124   : > { %v494_v63 = vsel %vm478_vm4, 1, %v1999_v17  ;;  %v495_v2 = vsel %vm479_vm5, 1, %v1999_v17 }
 0x125   : > { %v510_v10 = vadd.s32 %v494_v63, %v2420_v40  ;;  %v511_v11 = vadd.s32 %v495_v2, %v2422_v41  ;;  %v649_v40 = vpop.permute.xlu0 %648 }
 0x126   : > { %vm664_vm2 = vcmp.eq.s32.totalorder %v649_v40, %v2339_v35  ;;  %vm665_vm3 = vcmp.eq.s32.totalorder %v649_v40, %v2344_v38 }
 0x127   : > { %v640_v56 = vpop.permute.xlu1 %639  ;;  %v582_v18 = vadd.s32 %v566_v12, %v510_v10  ;;  %v583_v58 = vadd.s32 %v567_v13, %v511_v11 }
 0x128   : > { %vm659_vm10 = vcmp.eq.s32.totalorder %v640_v56, %v2344_v38  ;;  %vm658_vm13 = vcmp.eq.s32.totalorder %v640_v56, %v2339_v35 }
 0x129   : > { %v598_v23 = vcvt.s32.f32 %v582_v18  ;;  %v599_v24 = vcvt.s32.f32 %v583_v58 }
 0x12b   : > { %v643_v6 = vpop.permute.xlu1 %642 }
 0x12c   : > { %vm660_vm11 = vcmp.eq.s32.totalorder %v643_v6, %v2339_v35  ;;  %vm661_vm12 = vcmp.eq.s32.totalorder %v643_v6, %v2344_v38 }
 0x12d   : > { %vm1674_vm14 = vmpackc.low %vm661_vm12, %vm659_vm10  ;;  %vm1436_vm10 = vcmask 7168  }
 0x12e   : > { %vm1676_vm15 = vmpackc.low %vm660_vm11, %vm658_vm13  ;;  %1675 = vmatprep.mubr.msk.bf16.mxu1 %vm1674_vm14, %v2000_v52 }
 0x12f   : > { %1677 = vmatmul.mubr.msk.bf16.gmra.mxu1 %vm1676_vm15, %v2000_v52 }
 0x130   : > { %v537_v16 = vpop.permute.xlu1 %536 }
 0x131   : > { %vm552_vm0 = vcmp.eq.s32.totalorder %v537_v16, %v2339_v35  ;;  %vm553_vm1 = vcmp.eq.s32.totalorder %v537_v16, %v2344_v38 }
 0x132   : > { %v568_v41 = vsel %vm552_vm0, 1, %v1999_v17  ;;  %v569_v19 = vsel %vm553_vm1, 1, %v1999_v17 }
 0x133   : > { %v584_v20 = vadd.s32 %v568_v41, %v512_v14  ;;  %v585_v21 = vadd.s32 %v569_v19, %v513_v15 }
 0x135   : > { %v600_v8 = vcvt.s32.f32 %v584_v20  ;;  %v601_v25 = vcvt.s32.f32 %v585_v21  ;;  %v646_v26 = vpop.permute.xlu1 %645 }
 0x136   : > { %vm662_vm4 = vcmp.eq.s32.totalorder %v646_v26, %v2339_v35  ;;  %vm663_vm5 = vcmp.eq.s32.totalorder %v646_v26, %v2344_v38 }
 0x137   : > { %vm1678_vm6 = vmpackc.low %vm665_vm3, %vm663_vm5  ;;  %v609_v27 = vpack.c.bf16 %v601_v25, %v599_v24  ;;  %v608_v28 = vpack.c.bf16 %v600_v8, %v598_v23  ;;  %v2531_v25 = vld [vmem:[%s2137_s29] sm:$0xff] }
 0x138   : > { %vm1680_vm7 = vmpackc.low %vm664_vm2, %vm662_vm4  ;;  %1679 = vmatprep.mubr.msk.bf16.mxu1 %vm1678_vm6, %v2000_v52 }
 0x139   : > { %960 = vmatprep.mubr.bf16.mxu0 %v609_v27  ;;  %1681 = vmatmul.mubr.msk.bf16.gmra.mxu1 %vm1680_vm7, %v2000_v52  ;;  %v2534_v27 = vld [vmem:[%s2137_s29 + $0x8] sm:$0xff] }
 0x13a   : > { %961 = vmatmul.mubr.bf16.gmra.mxu0 %v608_v28 }
 0x1a3   : > { %v932_v17 = vpop.f32.mrf.mxu0 }
 0x1a5   : > { %v934_v29 = vpop.f32.mrf.mxu0 }
 0x1a7   : > { %v936_v22 = vpop.f32.mrf.mxu0 }
 0x1a9   : > { %v938_v38 = vpop.f32.mrf.mxu0 }
 0x1b2   : > { %v1197_v30 = vpop.f32.mrf.mxu1 }
 0x1b3   : > { %v1236_v31 = vmul.f32 %v1197_v30, %v932_v17 }
 0x1b4   : > { %v1199_v1 = vpop.f32.mrf.mxu1 }
 0x1b5   : > { %v1237_v0 = vmul.f32 %v1199_v1, %v934_v29  ;;  %v2537_v29 = vld [vmem:[%s2137_s29 + $0x10] sm:$0xff] }
 0x1b6   : > { %v1201_v35 = vpop.f32.mrf.mxu1 }
 0x1b7   : > { %v1252_v32 = vadd.f32 %v1237_v0, %v1236_v31  ;;  %v1238_v34 = vmul.f32 %v1201_v35, %v936_v22  ;;  %v2549_v0 = vld [vmem:[%s2137_s29 + $0x18] sm:$0xff] }
 0x1b8   : > { %v1203_v33 = vpop.f32.mrf.mxu1 }
 0x1b9   : > { %v1239_v36 = vmul.f32 %v1203_v33, %v938_v38  ;;  %1253 = vadd.xlane.f32.xlu1 %v1252_v32 }
 0x1bb   : > { %v1255_v37 = vadd.f32 %v1239_v36, %v1238_v34 }
 0x1bc   : > { %v942_v5 = vpop.f32.mrf.mxu0 }
 0x1bd   : > { %1256 = vadd.xlane.f32.xlu0 %v1255_v37 }
 0x1be   : > { %v944_v39 = vpop.f32.mrf.mxu0 }
 0x1c0   : > { %v946_v42 = vpop.f32.mrf.mxu0 }
 0x1c2   : > { %v948_v48 = vpop.f32.mrf.mxu0 }
 0x1ce   : > { %v1207_v52 = vpop.f32.mrf.mxu1 }
 0x1cf   : > { %v1240_v44 = vmul.f32 %v1207_v52, %v942_v5 }
 0x1d0   : > { %v1209_v43 = vpop.f32.mrf.mxu1 }
 0x1d1   : > { %v1241_v45 = vmul.f32 %v1209_v43, %v944_v39 }
 0x1d2   : > { %v1211_v46 = vpop.f32.mrf.mxu1 }
 0x1d3   : > { %v1258_v47 = vadd.f32 %v1241_v45, %v1240_v44  ;;  %v1242_v50 = vmul.f32 %v1211_v46, %v946_v42  ;;  %v2559_v45 = vld [vmem:[%s2137_s29 + $0x20] sm:$0xff] }
 0x1d4   : > { %v1213_v49 = vpop.f32.mrf.mxu1 }
 0x1d5   : > { %v1243_v51 = vmul.f32 %v1213_v49, %v948_v48  ;;  %1259 = vadd.xlane.f32.xlu1 %v1258_v47  ;;  %v2565_v49 = vld [vmem:[%s2137_s29 + $0x28] sm:$0xff] }
 0x1d7   : > { %v1261_v53 = vadd.f32 %v1243_v51, %v1242_v50 }
 0x1d9   : > { %1262 = vadd.xlane.f32.xlu0 %v1261_v53 }
 0x1dd   : > { %v952_v54 = vpop.f32.mrf.mxu0 }
 0x1df   : > { %v954_v55 = vpop.f32.mrf.mxu0 }
 0x1e1   : > { %v956_v57 = vpop.f32.mrf.mxu0 }
 0x1e3   : > { %v958_v2 = vpop.f32.mrf.mxu0 }
 0x1ef   : > { %v1217_v56 = vpop.f32.mrf.mxu1 }
 0x1f0   : > { %v1244_v60 = vmul.f32 %v1217_v56, %v952_v54 }
 0x1f1   : > { %v1219_v59 = vpop.f32.mrf.mxu1 }
 0x1f2   : > { %v1245_v61 = vmul.f32 %v1219_v59, %v954_v55  ;;  %v2573_v59 = vld [vmem:[%s2137_s29 + $0x30] sm:$0xff] }
 0x1f3   : > { %v1221_v62 = vpop.f32.mrf.mxu1 }
 0x1f4   : > { %v1264_v63 = vadd.f32 %v1245_v61, %v1244_v60  ;;  %v1246_v4 = vmul.f32 %v1221_v62, %v956_v57 }
 0x1f5   : > { %v1223_v3 = vpop.f32.mrf.mxu1 }
 0x1f6   : > { %v1247_v6 = vmul.f32 %v1223_v3, %v958_v2  ;;  %1265 = vadd.xlane.f32.xlu1 %v1264_v63 }
 0x1f8   : > { %v1267_v7 = vadd.f32 %v1247_v6, %v1246_v4 }
 0x1f9   : > { %v1227_v9 = vpop.f32.mrf.mxu1 }
 0x1fa   : > { %1268 = vadd.xlane.f32.xlu0 %v1267_v7  ;;  %v962_v10 = vpop.f32.mrf.mxu0 }
 0x1fb   : > { %v1229_v11 = vpop.f32.mrf.mxu1  ;;  %v1248_v13 = vmul.f32 %v1227_v9, %v962_v10 }
 0x1fc   : > { %v964_v12 = vpop.f32.mrf.mxu0 }
 0x1fd   : > { %v1249_v14 = vmul.f32 %v1229_v11, %v964_v12  ;;  %v1231_v15 = vpop.f32.mrf.mxu1  ;;  %v2585_v12 = vld [vmem:[%s2137_s29 + $0x38] sm:$0xff]  ;;  %s1577_s29 = sshll.u32 %s2726_s22, 3 }
 0x1fe   : > { %v966_v16 = vpop.f32.mrf.mxu0  ;;  %s302_s26 = scalar_lea.vmem %s2699_s5, %s1577_s29 }
 0x1ff   : > { %v1233_v18 = vpop.f32.mrf.mxu1  ;;  %v1270_v58 = vadd.f32 %v1249_v14, %v1248_v13  ;;  %v1250_v41 = vmul.f32 %v1231_v15, %v966_v16 }
 0x200   : > { %v968_v40 = vpop.f32.mrf.mxu0 }
 0x201   : > { %v1251_v19 = vmul.f32 %v1233_v18, %v968_v40  ;;  %1271 = vadd.xlane.f32.xlu1 %v1270_v58 }
 0x203   : > { %v1273_v20 = vadd.f32 %v1251_v19, %v1250_v41 }
 0x205   : > { %1274 = vadd.xlane.f32.xlu0 %v1273_v20 }
 0x242   : > { %v1254_v21 = vpop.xlane.xlu1 %1253 }
 0x243   : > { %v1284_v8 = vmul.f32 0.25, %v1254_v21 }
 0x245   : > { %v2540_v30 = vmul.f32 %v1284_v8, %v2531_v25 }
 0x246   : > { %v1257_v23 = vpop.xlane.xlu0 %1256 }
 0x247   : > { %v1285_v26 = vmul.f32 0.25, %v1257_v23  ;;  %v1308_v35 = vand.u32 2147483647, %v2540_v30 }
 0x249   : > { %v2543_v22 = vmul.f32 %v1285_v26, %v2534_v27  ;;  %v1316_v34 = vsub.f32 0.0, %v1308_v35 }
 0x24b   : > { %v1309_v32 = vand.u32 2147483647, %v2543_v22  ;;  %v1324_v39 = vmul.f32 1.442695, %v1316_v34 }
 0x24d   : > { %v1317_v36 = vsub.f32 0.0, %v1309_v32  ;;  %1866 = vpow2.f32 %v1324_v39 }
 0x24f   : > { %v1326_v52 = vmul.f32 1.442695, %v1317_v36 }
 0x251   : > { %1868 = vpow2.f32 %v1326_v52 }
 0x25a   : > { %v1867_v61 = vpop.eup %1866 }
 0x25b   : > { %v1340_v7 = vadd.f32 1.0, %v1867_v61  ;;  %v1343_v8 = vmul.f32 -0.5, %v1867_v61 }
 0x25d   : > { %v1344_v32 = vadd.f32 1.0, %v1343_v8 }
 0x25e   : > { %v1260_v24 = vpop.xlane.xlu1 %1259  ;;  %v2575_v2 = vpop.eup %1868 }
 0x25f   : > { %v1286_v28 = vmul.f32 0.25, %v1260_v24  ;;  %v1349_v10 = vadd.f32 1.0, %v2575_v2  ;;  %v1352_v26 = vmul.f32 -0.5, %v2575_v2 }
 0x261   : > { %v2546_v31 = vmul.f32 %v1286_v28, %v2537_v29  ;;  %v1353_v39 = vadd.f32 1.0, %v1352_v26 }
 0x262   : > { %v1263_v17 = vpop.xlane.xlu0 %1262 }
 0x263   : > { %v1287_v1 = vmul.f32 0.25, %v1263_v17  ;;  %v1310_v33 = vand.u32 2147483647, %v2546_v31 }
 0x265   : > { %v2554_v38 = vmul.f32 %v1287_v1, %v2549_v0  ;;  %v1318_v5 = vsub.f32 0.0, %v1310_v33  ;;  %v1346_v33 = vand.u32 2147483647, %v1867_v61 }
 0x267   : > { %v1311_v37 = vand.u32 2147483647, %v2554_v38  ;;  %v1328_v43 = vmul.f32 1.442695, %v1318_v5  ;;  %v1421_v5 = vand.u32 2147483647, %v2534_v27 }
 0x268   : > { %vm2612_vm8 = vcmp.lt.f32.partialorder %v1346_v33, 0.0004427343  ;;  %v1423_v33 = vand.u32 2147483647, %v2549_v0 }
 0x269   : > { %v1319_v42 = vsub.f32 0.0, %v1311_v37  ;;  %1870 = vpow2.f32 %v1328_v43  ;;  %v1420_v37 = vand.u32 2147483647, %v2531_v25 }
 0x26b   : > { %v1330_v44 = vmul.f32 1.442695, %v1319_v42  ;;  %v1300_v42 = vmin.f32 %v2540_v30, 0.0  ;;  %v1354_v30 = vmul.f32 %v2575_v2, %v1353_v39 }
 0x26d   : > { %1872 = vpow2.f32 %v1330_v44  ;;  %v1355_v44 = vand.u32 2147483647, %v2575_v2 }
 0x26f   : > { %vm2622_vm9 = vcmp.lt.f32.partialorder %v1355_v44, 0.0004427343 }
 0x276   : > { %v2577_v3 = vpop.eup %1870 }
 0x277   : > { %v1358_v14 = vadd.f32 1.0, %v2577_v3  ;;  %v1361_v1 = vmul.f32 -0.5, %v2577_v3  ;;  %v1364_v27 = vand.u32 2147483647, %v2577_v3 }
 0x279   : > { %vm2633_vm11 = vcmp.lt.f32.partialorder %v1364_v27, 0.0004427343 }
 0x27a   : > { %v2587_v13 = vpop.eup %1872 }
 0x27b   : > { %v1367_v58 = vadd.f32 1.0, %v2587_v13  ;;  %v1370_v34 = vmul.f32 -0.5, %v2587_v13 }
 0x27f   : > { %v1266_v46 = vpop.xlane.xlu1 %1265 }
 0x280   : > { %v1288_v47 = vmul.f32 0.25, %v1266_v46 }
 0x282   : > { %v2562_v48 = vmul.f32 %v1288_v47, %v2559_v45  ;;  %v1362_v47 = vadd.f32 1.0, %v1361_v1  ;;  %v1422_v1 = vand.u32 2147483647, %v2537_v29 }
 0x283   : > { %v1269_v50 = vpop.xlane.xlu0 %1268 }
 0x284   : > { %v1312_v51 = vand.u32 2147483647, %v2562_v48  ;;  %v1289_v53 = vmul.f32 0.25, %v1269_v50  ;;  %v1363_v2 = vmul.f32 %v2577_v3, %v1362_v47 }
 0x286   : > { %v1320_v54 = vsub.f32 0.0, %v1312_v51  ;;  %v2569_v55 = vmul.f32 %v1289_v53, %v2565_v49 }
 0x288   : > { %v1332_v56 = vmul.f32 1.442695, %v1320_v54  ;;  %v1313_v57 = vand.u32 2147483647, %v2569_v55  ;;  %v1345_v54 = vmul.f32 %v1867_v61, %v1344_v32  ;;  %v1303_v32 = vmin.f32 %v2554_v38, 0.0 }
 0x289   : > { %v1305_v38 = vmin.f32 %v2569_v55, 0.0 }
 0x28a   : > { %1874 = vpow2.f32 %v1332_v56  ;;  %v1272_v60 = vpop.xlane.xlu1 %1271  ;;  %v1321_v62 = vsub.f32 0.0, %v1313_v57  ;;  %v1371_v56 = vadd.f32 1.0, %v1370_v34 }
 0x28b   : > { %v1290_v63 = vmul.f32 0.25, %v1272_v60 }
 0x28c   : > { %v1334_v4 = vmul.f32 1.442695, %v1321_v62 }
 0x28d   : > { %v2580_v6 = vmul.f32 %v1290_v63, %v2573_v59  ;;  %v1301_v63 = vmin.f32 %v2543_v22, 0.0 }
 0x28e   : > { %v1275_v9 = vpop.xlane.xlu0 %1274  ;;  %1876 = vpow2.f32 %v1334_v4  ;;  %v1373_v4 = vand.u32 2147483647, %v2587_v13 }
 0x28f   : > { %v1314_v11 = vand.u32 2147483647, %v2580_v6  ;;  %v1291_v15 = vmul.f32 0.25, %v1275_v9  ;;  %1878 = vlog2.f32 %v1340_v7 }
 0x290   : > { %1880 = vlog2.f32 %v1349_v10  ;;  %vm2642_vm12 = vcmp.lt.f32.partialorder %v1373_v4, 0.0004427343 }
 0x291   : > { %v1322_v16 = vsub.f32 0.0, %v1314_v11  ;;  %v2591_v18 = vmul.f32 %v1291_v15, %v2585_v12  ;;  %1882 = vlog2.f32 %v1358_v14  ;;  %v1302_v15 = vmin.f32 %v2546_v31, 0.0 }
 0x293   : > { %v1336_v40 = vmul.f32 1.442695, %v1322_v16  ;;  %v1315_v41 = vand.u32 2147483647, %v2591_v18  ;;  %v1372_v16 = vmul.f32 %v2587_v13, %v1371_v56  ;;  %v1307_v22 = vmin.f32 %v2591_v18, 0.0 }
 0x295   : > { %1884 = vpow2.f32 %v1336_v40  ;;  %v1323_v19 = vsub.f32 0.0, %v1315_v41 }
 0x296   : > { %1886 = vlog2.f32 %v1367_v58 }
 0x297   : > { %v2595_v20 = vpop.eup %1874  ;;  %v1338_v23 = vmul.f32 1.442695, %v1323_v19 }
 0x298   : > { %v1376_v21 = vadd.f32 1.0, %v2595_v20  ;;  %v1379_v50 = vmul.f32 -0.5, %v2595_v20  ;;  %v1382_v58 = vand.u32 2147483647, %v2595_v20 }
 0x29a   : > { %1888 = vlog2.f32 %v1376_v21  ;;  %v1380_v11 = vadd.f32 1.0, %v1379_v50  ;;  %vm1383_vm13 = vcmp.lt.f32.partialorder %v1382_v58, 0.0004427343 }
 0x29b   : > { %1890 = vpow2.f32 %v1338_v23  ;;  %v2598_v24 = vpop.eup %1876 }
 0x29c   : > { %v1385_v28 = vadd.f32 1.0, %v2598_v24  ;;  %v1879_v17 = vpop.eup %1878  ;;  %v1388_v60 = vmul.f32 -0.5, %v2598_v24  ;;  %v1391_v31 = vand.u32 2147483647, %v2598_v24  ;;  %v1381_v26 = vmul.f32 %v2595_v20, %v1380_v11 }
 0x29d   : > { %v1881_v35 = vpop.eup %1880  ;;  %v1342_v43 = vmul.f32 0.6931472, %v1879_v17  ;;  %v1304_v20 = vmin.f32 %v2562_v48, 0.0  ;;  %v1425_v48 = vand.u32 2147483647, %v2565_v49 }
 0x29e   : > { %1892 = vlog2.f32 %v1385_v28  ;;  %v1883_v36 = vpop.eup %1882  ;;  %v1351_v46 = vmul.f32 0.6931472, %v1881_v35  ;;  %v1389_v3 = vadd.f32 1.0, %v1388_v60  ;;  %vm1392_vm14 = vcmp.lt.f32.partialorder %v1391_v31, 0.0004427343 }
 0x29f   : > { %v1360_v57 = vmul.f32 0.6931472, %v1883_v36  ;;  %v1348_v62 = vsel %vm2612_vm8, %v1345_v54, %v1342_v43 }
 0x2a0   : > { %v1357_v9 = vsel %vm2622_vm9, %v1354_v30, %v1351_v46  ;;  %v1412_v21 = vsub.f32 %v1300_v42, %v1348_v62  ;;  %v1390_v39 = vmul.f32 %v2598_v24, %v1389_v3  ;;  %v1424_v46 = vand.u32 2147483647, %v2559_v45 }
 0x2a1   : > { %v1366_v40 = vsel %vm2633_vm11, %v1363_v2, %v1360_v57  ;;  %v1413_v23 = vsub.f32 %v1301_v63, %v1357_v9  ;;  %v1426_v45 = vand.u32 2147483647, %v2573_v59  ;;  %v1306_v57 = vmin.f32 %v2580_v6, 0.0 }
 0x2a2   : > { %v2606_v52 = vpop.eup %1884  ;;  %v1414_v35 = vsub.f32 %v1302_v15, %v1366_v40  ;;  %v1428_v44 = vmul.f32 %v1420_v37, %v1412_v21  ;;  %v1427_v6 = vand.u32 2147483647, %v2585_v12 }
 0x2a3   : > { %v1394_v51 = vadd.f32 1.0, %v2606_v52  ;;  %v1887_v53 = vpop.eup %1886  ;;  %v1397_v28 = vmul.f32 -0.5, %v2606_v52  ;;  %v1429_v42 = vmul.f32 %v1421_v5, %v1413_v23  ;;  %v1400_v0 = vand.u32 2147483647, %v2606_v52 }
 0x2a4   : > { %v1369_v10 = vmul.f32 0.6931472, %v1887_v53  ;;  %v1430_v50 = vmul.f32 %v1422_v1, %v1414_v35  ;;  %v1437_v37 = vsel %vm1436_vm10, %v1428_v44, 0.0 }
 0x2a5   : > { %1894 = vlog2.f32 %v1394_v51  ;;  %v1398_v29 = vadd.f32 1.0, %v1397_v28  ;;  %v1438_v24 = vsel %vm1436_vm10, %v1429_v42, 0.0  ;;  %vm1401_vm15 = vcmp.lt.f32.partialorder %v1400_v0, 0.0004427343 }
 0x2a6   : > { %v1375_v13 = vsel %vm2642_vm12, %v1372_v16, %v1369_v10  ;;  %v1440_v55 = vsel %vm1436_vm10, %v1430_v50, 0.0  ;;  %v1439_v60 = vadd.f32 %v1438_v24, %v1437_v37 }
 0x2a7   : > { %v1889_v7 = vpop.eup %1888  ;;  %v1415_v43 = vsub.f32 %v1303_v32, %v1375_v13  ;;  %v1399_v56 = vmul.f32 %v2606_v52, %v1398_v29 }
 0x2a8   : > { %v2630_v14 = vpop.eup %1890  ;;  %v1378_v41 = vmul.f32 0.6931472, %v1889_v7  ;;  %v1441_v9 = vadd.f32 %v1440_v55, %v1439_v60 }
 0x2a9   : > { %v1403_v19 = vadd.f32 1.0, %v2630_v14  ;;  %v1406_v53 = vmul.f32 -0.5, %v2630_v14  ;;  %v1431_v5 = vmul.f32 %v1423_v33, %v1415_v43  ;;  %v1409_v7 = vand.u32 2147483647, %v2630_v14 }
 0x2aa   : > { %v1384_v34 = vsel %vm1383_vm13, %v1381_v26, %v1378_v41 }
 0x2ab   : > { %1896 = vlog2.f32 %v1403_v19  ;;  %v1893_v17 = vpop.eup %1892  ;;  %v1416_v51 = vsub.f32 %v1304_v20, %v1384_v34  ;;  %v1407_v63 = vadd.f32 1.0, %v1406_v53  ;;  %v1442_v61 = vsel %vm1436_vm10, %v1431_v5, 0.0 }
 0x2ac   : > { %v1387_v36 = vmul.f32 0.6931472, %v1893_v17  ;;  %v1443_v15 = vadd.f32 %v1442_v61, %v1441_v9  ;;  %vm1410_vm0 = vcmp.lt.f32.partialorder %v1409_v7, 0.0004427343 }
 0x2ad   : > { %v1432_v30 = vmul.f32 %v1424_v46, %v1416_v51  ;;  %v1408_v11 = vmul.f32 %v2630_v14, %v1407_v63 }
 0x2ae   : > { %v1393_v47 = vsel %vm1392_vm14, %v1390_v39, %v1387_v36 }
 0x2af   : > { %v1417_v25 = vsub.f32 %v1305_v38, %v1393_v47  ;;  %v1444_v52 = vsel %vm1436_vm10, %v1432_v30, 0.0 }
 0x2b0   : > { %v1445_v40 = vadd.f32 %v1444_v52, %v1443_v15 }
 0x2b1   : > { %v1433_v49 = vmul.f32 %v1425_v48, %v1417_v25 }
 0x2b2   : > { %v1895_v54 = vpop.eup %1894 }
 0x2b3   : > { %v1396_v27 = vmul.f32 0.6931472, %v1895_v54  ;;  %v1446_v16 = vsel %vm1436_vm10, %v1433_v49, 0.0 }
 0x2b4   : > { %v1447_v19 = vadd.f32 %v1446_v16, %v1445_v40 }
 0x2b5   : > { %v1402_v62 = vsel %vm1401_vm15, %v1399_v56, %v1396_v27 }
 0x2b6   : > { %v1418_v4 = vsub.f32 %v1306_v57, %v1402_v62 }
 0x2b8   : > { %v1897_v59 = vpop.eup %1896  ;;  %v1434_v2 = vmul.f32 %v1426_v45, %v1418_v4 }
 0x2b9   : > { %v1405_v10 = vmul.f32 0.6931472, %v1897_v59 }
 0x2ba   : > { %v1448_v3 = vsel %vm1436_vm10, %v1434_v2, 0.0 }
 0x2bb   : > { %v1411_v58 = vsel %vm1410_vm0, %v1408_v11, %v1405_v10  ;;  %v1449_v23 = vadd.f32 %v1448_v3, %v1447_v19 }
 0x2bc   : > { %v1419_v41 = vsub.f32 %v1307_v22, %v1411_v58 }
 0x2be   : > { %v1435_v21 = vmul.f32 %v1427_v6, %v1419_v41 }
 0x2c0   : > { %v1450_v14 = vsel %vm1436_vm10, %v1435_v21, 0.0 }
 0x2c1   : > { %v1451_v8 = vadd.f32 %v1450_v14, %v1449_v23 }
 0x2c3   : > { %1452 = vadd.xlane.f32.xlu1 %v1451_v8 }
 0x34c   : > { %v1453_v12 = vpop.xlane.xlu1 %1452 }
 0x34d   : > { %v1454_v31 = vrot.slane %v1453_v12, 4 }
 0x34f   : > { %v1455_v18 = vadd.f32 %v1454_v31, %v1453_v12 }
 0x351   : > { %v1456_v13 = vrot.slane %v1455_v18, 2 }
 0x353   : > { %v1457_v26 = vadd.f32 %v1456_v13, %v1455_v18 }
 0x355   : > { %v1458_v28 = vrot.slane %v1457_v26, 1 }
 0x357   : > { %v1459_v17 = vadd.f32 %v1458_v28, %v1457_v26 }
 0x359   : > { %1685 = vpush %v1459_v17 }
 0x38a   : > { %s1686_s25 = spop %1685 }
 0x38b   : > { %s1461_s27 = ssub.f32 0.0, %s1686_s25 }
 0x38d   : > { %v1462_v1 = vstv %s1461_s27 }
 0x38e   : > { %1463 = vst [vmem:[%s302_s26] sm:$0xff] %v1462_v1 }
 0x38f PF: > { %p16_p2 = scmp.ge.s32.totalorder %s2075_s28, 4   ;;  %s2719_s18 = smov %s1982_s19 }
 0x390   : > { %s2720_s19 = smov %s1986_s20  ;;  %s2721_s20 = smov %s2095_s11 }
 0x391   : > { %s2722_s21 = smov %s2075_s28  ;;  %18 = sbr.rel (!%p16_p2) target bundleno = 4 (0x4), region = 90 }
 0x396   :  { %1483 = vsyncpa [#allocation3], 1 }
 0x397   :  { %1485 = vsyncpa [#allocation3 + $0x1], 1 }
 0x398   :  { %1486 = vsyncpa [#allocation5], 1 }

</bundles_post_ra>
